<compile_context>
chip_gen: v7x
topology: tpu7x:2x2x1
jax: 0.10.0
libtpu: 0.0.40
codegen_flags: <defaults>
</compile_context>

<pallas_src>
import functools

import jax
import jax.numpy as jnp
from jax.experimental import pallas as pl
from jax.experimental.pallas import tpu as pltpu


def _mha_kernel(x_ref, wq_ref, bq_ref, wk_ref, bk_ref, wv_ref, bv_ref,
                wo_ref, bo_ref, out_ref, *attn_refs,
                bb, seq_len, n_heads, d_k, d_v, compute_dtype):
    """One grid step = `bb` batch elements (bb*seq_len rows).

    Heads are handled by a statically-unrolled loop over pre-split per-head
    weight slabs, so the kernel contains no lane-narrow slices, concatenates
    or 4-D transposes (the copy traffic the perf review flagged).  The only
    vector ops besides matmuls are the softmax and the output accumulation.
    """
    attn_ref = attn_refs[0] if attn_refs else None
    L, H = seq_len, n_heads
    d_model = out_ref.shape[-1]
    exact = compute_dtype == jnp.float32

    x = x_ref[...]                                           # [bb*L, D]
    acc = jnp.zeros((bb * L, d_model), jnp.float32)          # output accumulator

    for h in range(H):                                       # static unroll
        # Per-head projections: leading-index loads of resident [H, D, d]
        # slabs, plain 2-D MXU matmuls, f32 accumulation, f32 bias add.
        # (softmax scale is already folded into W_Q / b_Q wrapper-side.)
        q = (jnp.dot(x, wq_ref[h], preferred_element_type=jnp.float32)
             + bq_ref[h]).reshape(bb, L, d_k)
        k = (jnp.dot(x, wk_ref[h], preferred_element_type=jnp.float32)
             + bk_ref[h]).reshape(bb, L, d_k)
        v = (jnp.dot(x, wv_ref[h], preferred_element_type=jnp.float32)
             + bv_ref[h]).reshape(bb, L, d_v)

        # Scores + softmax for this head, all bb batch elements at once.
        s = jnp.einsum("bqd,bkd->bqk", q.astype(compute_dtype),
                       k.astype(compute_dtype),
                       preferred_element_type=jnp.float32)   # [bb, L, L]
        m = jnp.max(s, axis=-1, keepdims=True)
        e = jnp.exp(s - m)
        denom = jnp.sum(e, axis=-1, keepdims=True)
        # EUP reciprocal on the low-precision path (off the VPU critical path);
        # exact division on the f32 path.
        attn = e * pl.reciprocal(denom, approx=not exact)

        if attn_ref is not None:
            attn_ref[:, h] = attn.astype(attn_ref.dtype)

        ctx = jnp.einsum("bqk,bkv->bqv", attn.astype(compute_dtype),
                         v.astype(compute_dtype),
                         preferred_element_type=jnp.float32)  # [bb, L, d_v]

        # Output projection fused into the head loop as an accumulation:
        # out = sum_h ctx_h @ W_O[h]  (+ b_O once at the end).  No
        # [bb*L, H*d_v] concat is ever materialized.
        acc = acc + jnp.dot(ctx.reshape(bb * L, d_v).astype(compute_dtype),
                            wo_ref[h], preferred_element_type=jnp.float32)

    out_ref[...] = (acc + bo_ref[...]).astype(out_ref.dtype)  # [bb*L, D]


def _tpu_memory_info():
    """Best-effort (VMEM capacity bytes, TensorCores per chip) for this TPU."""
    vmem_cap = 128 * 1024 * 1024
    num_tc = 1
    try:
        vmem_cap = int(pltpu.get_tpu_info().vmem_capacity_bytes)
    except Exception:
        pass
    try:
        if "v7" in jax.devices()[0].device_kind.lower():
            num_tc = 2          # v7x: 2 TensorCores share the chip
    except Exception:
        pass
    return vmem_cap, num_tc


def _pick_batch_block(bs, L, H, d_model, d_k, d_v, *, with_attn,
                      compute_itemsize, out_itemsize, attn_itemsize,
                      resident_bytes, budget_bytes, target_rows=1024,
                      min_steps=1):
    """Largest legal divisor of bs whose per-step VMEM footprint fits the budget.

    The footprint model covers the double-buffered input/output blocks, the
    resident weights AND the in-kernel temporaries (f32 accumulator, per-head
    q/k/v/scores/ctx values and their compute-dtype casts).  When min_steps>1
    (v7x, 2 TensorCores) the grid is kept at least that long so the 'parallel'
    batch axis can be split across cores."""
    def step_bytes(bb):
        rows = bb * L
        d_m = max(d_k, d_v)
        blocks = 2 * rows * d_model * compute_itemsize             # x (dbl buf)
        blocks += 2 * rows * d_model * out_itemsize                # out (dbl buf)
        if with_attn:
            blocks += 2 * bb * H * L * L * attn_itemsize           # attn (dbl buf)
        temps = rows * d_model * 4                                 # f32 accumulator
        temps += rows * d_model * compute_itemsize                 # x value
        temps += 3 * rows * d_m * (4 + compute_itemsize)           # q, k, v (+casts)
        temps += bb * L * L * (3 * 4 + compute_itemsize)           # s, e, attn (+cast)
        temps += rows * d_v * (4 + compute_itemsize)               # ctx (+cast)
        return resident_bytes + blocks + (5 * temps) // 4          # 1.25x fudge

    # Legal blocks keep bb*L a multiple of 8 (sublane alignment) unless bb==bs
    # (block == full array is always legal).
    cands = [c for c in range(1, bs + 1)
             if bs % c == 0 and ((c * L) % 8 == 0 or c == bs)]
    if min_steps > 1:
        multi = [c for c in cands if bs // c >= min_steps]
        if multi:
            cands = multi
    fitting = [c for c in cands
               if c * L <= target_rows and step_bytes(c) <= budget_bytes]
    if fitting:
        return max(fitting)
    # Best effort: smallest legal block (never silently the full batch unless
    # it is the only legal choice, e.g. seq_len with no 8-aligned divisor).
    return min(cands)


def multihead_attention(Q, K=None, V=None, *, params, n_heads,
                        return_attn_weights=True,
                        compute_dtype=jnp.bfloat16,
                        attn_dtype=jnp.float32,
                        batch_block=None):
    """Forward pass of PatchTST's _MultiheadAttention (eval mode)."""
    if K is None:
        K = Q
    if V is None:
        V = Q
    if (K is not Q) or (V is not Q):
        # TODO(synk): cross-attention (K/V is not Q) needs a kernel variant with
        # a separate KV activation input; PatchTST only exercises K = V = Q.
        raise NotImplementedError("only the self-attention path (K is V is Q) is implemented")

    bs, L, d_model = Q.shape
    H = n_heads
    d_k = params["W_Q"].shape[1] // H
    d_v = params["W_V"].shape[1] // H
    # Matches the PyTorch module: scale derived from d_model // n_heads (lsa=False).
    scale = float(d_model // H) ** (-0.5)

    cd = jnp.dtype(compute_dtype)
    f32 = jnp.float32

    # Per-head weight slabs [H, D, d] / [H, 1, d]; softmax scale folded into
    # W_Q / b_Q (in f32, before the optional low-precision cast).  Biases stay
    # f32 — they are added to the f32 MXU accumulators inside the kernel.
    def per_head_w(w, d):
        return jnp.transpose(w.reshape(d_model, H, d), (1, 0, 2)).astype(cd)

    w_q = per_head_w(params["W_Q"] * scale, d_k)
    w_k = per_head_w(params["W_K"], d_k)
    w_v = per_head_w(params["W_V"], d_v)
    b_q = (params["b_Q"] * scale).reshape(H, 1, d_k).astype(f32)
    b_k = params["b_K"].reshape(H, 1, d_k).astype(f32)
    b_v = params["b_V"].reshape(H, 1, d_v).astype(f32)
    w_o = params["W_O"].reshape(H, d_v, d_model).astype(cd)
    b_o = params["b_O"].reshape(1, d_model).astype(f32)

    consts = (w_q, b_q, w_k, b_k, w_v, b_v, w_o, b_o)
    resident_bytes = 2 * sum(int(a.size) * a.dtype.itemsize for a in consts)

    # Generation-aware VMEM budgeting (v7x: 64 MiB VMEM, 2 TensorCores).
    vmem_cap, num_tc = _tpu_memory_info()
    vmem_limit = min(64 * 1024 * 1024, vmem_cap // 2)

    if batch_block is not None:
        bb = batch_block
    else:
        bb = _pick_batch_block(
            bs, L, H, d_model, d_k, d_v,
            with_attn=return_attn_weights,
            compute_itemsize=cd.itemsize,
            out_itemsize=jnp.dtype(Q.dtype).itemsize,
            attn_itemsize=jnp.dtype(attn_dtype).itemsize,
            resident_bytes=resident_bytes,
            budget_bytes=int(0.8 * vmem_limit),
            target_rows=1024,
            min_steps=num_tc,
        )
    assert bs % bb == 0, (bs, bb)
    grid = (bs // bb,)

    # Self-attention activation, flattened wrapper-side to [bs*L, d_model] so
    # each grid step's projection matmuls see bb*L rows (layout plumbing only).
    x = Q.reshape(bs * L, d_model).astype(cd)

    kernel = functools.partial(
        _mha_kernel, bb=bb, seq_len=L, n_heads=H, d_k=d_k, d_v=d_v,
        compute_dtype=cd)

    def const_spec(a):
        zeros = (0,) * a.ndim
        return pl.BlockSpec(a.shape, lambda i, _z=zeros: _z)

    in_specs = [pl.BlockSpec((bb * L, d_model), lambda i: (i, 0))]   # activations
    in_specs += [const_spec(a) for a in consts]                      # resident weights

    # TODO(synk): if a deployment config has d_model < 128, flatten the main
    # output to a lane-dense [bs, L*d_model] layout (reshape wrapper-side) to
    # avoid masked partial stores.
    out_spec_o = pl.BlockSpec((bb * L, d_model), lambda i: (i, 0))
    if return_attn_weights:
        out_shape = (jax.ShapeDtypeStruct((bs * L, d_model), Q.dtype),
                     jax.ShapeDtypeStruct((bs, H, L, L), attn_dtype))
        out_specs = (out_spec_o,
                     pl.BlockSpec((bb, H, L, L), lambda i: (i, 0, 0, 0)))
    else:
        out_shape = jax.ShapeDtypeStruct((bs * L, d_model), Q.dtype)
        out_specs = out_spec_o

    res = pl.pallas_call(
        kernel,
        out_shape=out_shape,
        grid_spec=pltpu.PrefetchScalarGridSpec(
            num_scalar_prefetch=0,
            grid=grid,
            in_specs=in_specs,
            out_specs=out_specs,
        ),
        compiler_params=pltpu.CompilerParams(
            dimension_semantics=("parallel",),
            vmem_limit_bytes=vmem_limit,
        ),
    )(x, *consts)

    if return_attn_weights:
        out2, attn = res
        return out2.reshape(bs, L, d_model), attn
    return res.reshape(bs, L, d_model)


def _reference(Q, params, *, n_heads):
    """Pure-JAX reference mirroring the PyTorch forward (self-attention)."""
    bs, L, d_model = Q.shape
    d_k = params["W_Q"].shape[1] // n_heads
    d_v = params["W_V"].shape[1] // n_heads
    scale = float(d_model // n_heads) ** (-0.5)

    q_s = (Q @ params["W_Q"] + params["b_Q"]).reshape(bs, L, n_heads, d_k)
    q_s = jnp.transpose(q_s, (0, 2, 1, 3))                      # [bs,H,L,dk]
    k_s = (Q @ params["W_K"] + params["b_K"]).reshape(bs, L, n_heads, d_k)
    k_s = jnp.transpose(k_s, (0, 2, 3, 1))                      # [bs,H,dk,L]
    v_s = (Q @ params["W_V"] + params["b_V"]).reshape(bs, L, n_heads, d_v)
    v_s = jnp.transpose(v_s, (0, 2, 1, 3))                      # [bs,H,L,dv]

    scores = jnp.einsum("bhqd,bhdk->bhqk", q_s, k_s) * scale
    attn = jax.nn.softmax(scores, axis=-1)
    o = jnp.einsum("bhqk,bhkd->bhqd", attn, v_s)
    o = jnp.transpose(o, (0, 2, 1, 3)).reshape(bs, L, n_heads * d_v)
    out = o @ params["W_O"] + params["b_O"]
    return out, attn


if __name__ == "__main__":
    bs, seq_len, d_model, n_heads = 4, 8, 32, 4
    d_k = d_v = d_model // n_heads

    key = jax.random.PRNGKey(0)
    ks = jax.random.split(key, 9)

    # Deterministic synthetic parameters (stored as [in, out] so y = x @ W + b).
    params = {
        "W_Q": 0.1 * jax.random.normal(ks[0], (d_model, n_heads * d_k), jnp.float32),
        "b_Q": 0.1 * jax.random.normal(ks[1], (n_heads * d_k,), jnp.float32),
        "W_K": 0.1 * jax.random.normal(ks[2], (d_model, n_heads * d_k), jnp.float32),
        "b_K": 0.1 * jax.random.normal(ks[3], (n_heads * d_k,), jnp.float32),
        "W_V": 0.1 * jax.random.normal(ks[4], (d_model, n_heads * d_v), jnp.float32),
        "b_V": 0.1 * jax.random.normal(ks[5], (n_heads * d_v,), jnp.float32),
        "W_O": 0.1 * jax.random.normal(ks[6], (n_heads * d_v, d_model), jnp.float32),
        "b_O": 0.1 * jax.random.normal(ks[7], (d_model,), jnp.float32),
    }
    # Self-attention path of the module (K=None, V=None -> K = V = Q).
    Q = jax.random.normal(ks[8], (bs, seq_len, d_model), jnp.float32)

    out_ref, attn_ref = _reference(Q, params, n_heads=n_heads)

    # 1) Exact-precision path (f32 operands, auto-picked batch block).
    out32, attn32 = multihead_attention(Q, params=params, n_heads=n_heads,
                                        compute_dtype=jnp.float32)
    jax.block_until_ready((out32, attn32))
    assert out32.shape == (bs, seq_len, d_model)
    assert attn32.shape == (bs, n_heads, seq_len, seq_len)
    assert jnp.allclose(out32, out_ref, atol=1e-4, rtol=1e-4)
    assert jnp.allclose(attn32, attn_ref, atol=1e-5, rtol=1e-5)

    # 2) Fast path: bf16 MXU operands (f32 accumulate), bf16 attention-weight
    #    writeback, 2 grid steps.
    out_bf, attn_bf = multihead_attention(Q, params=params, n_heads=n_heads,
                                          compute_dtype=jnp.bfloat16,
                                          attn_dtype=jnp.bfloat16,
                                          batch_block=2)
    jax.block_until_ready((out_bf, attn_bf))
    assert jnp.allclose(out_bf, out_ref, atol=3e-2, rtol=3e-2)
    assert jnp.allclose(attn_bf.astype(jnp.float32), attn_ref, atol=1e-2, rtol=1e-2)

    # 3) attn-weights output can be skipped entirely when not needed.
    out_only = multihead_attention(Q, params=params, n_heads=n_heads,
                                   return_attn_weights=False,
                                   compute_dtype=jnp.float32)
    jax.block_until_ready(out_only)
    assert jnp.allclose(out_only, out_ref, atol=1e-4, rtol=1e-4)

    print("KERNEL_OK")
</pallas_src>

<mosaic_0001>
module attributes {stable_mosaic.version = 11 : i64} {
  func.func @_mha_kernel(%arg0: i32, %arg1: memref<32x32xf32, #tpu.memory_space<vmem>>, %arg2: memref<4x32x8xf32, #tpu.memory_space<vmem>>, %arg3: memref<4x1x8xf32, #tpu.memory_space<vmem>>, %arg4: memref<4x32x8xf32, #tpu.memory_space<vmem>>, %arg5: memref<4x1x8xf32, #tpu.memory_space<vmem>>, %arg6: memref<4x32x8xf32, #tpu.memory_space<vmem>>, %arg7: memref<4x1x8xf32, #tpu.memory_space<vmem>>, %arg8: memref<4x8x32xf32, #tpu.memory_space<vmem>>, %arg9: memref<1x32xf32, #tpu.memory_space<vmem>>, %arg10: memref<32x32xf32, #tpu.memory_space<vmem>>, %arg11: memref<4x4x8x8xf32, #tpu.memory_space<vmem>>) attributes {dimension_semantics = [#tpu.dimension_semantics<parallel>], iteration_bounds = array<i64: 1>, scalar_prefetch = 0 : i64, scratch_operands = 0 : i64, tpu.core_type = #tpu.core_type<tc>, window_params = [{transform_indices = @transform_0, window_bounds = array<i64: 32, 32>}, {pipeline_mode = #tpu.pipeline_mode<synchronous>, transform_indices = @transform_1, window_bounds = array<i64: 4, 32, 8>}, {pipeline_mode = #tpu.pipeline_mode<synchronous>, transform_indices = @transform_2, window_bounds = array<i64: 4, 1, 8>}, {pipeline_mode = #tpu.pipeline_mode<synchronous>, transform_indices = @transform_3, window_bounds = array<i64: 4, 32, 8>}, {pipeline_mode = #tpu.pipeline_mode<synchronous>, transform_indices = @transform_4, window_bounds = array<i64: 4, 1, 8>}, {pipeline_mode = #tpu.pipeline_mode<synchronous>, transform_indices = @transform_5, window_bounds = array<i64: 4, 32, 8>}, {pipeline_mode = #tpu.pipeline_mode<synchronous>, transform_indices = @transform_6, window_bounds = array<i64: 4, 1, 8>}, {pipeline_mode = #tpu.pipeline_mode<synchronous>, transform_indices = @transform_7, window_bounds = array<i64: 4, 8, 32>}, {pipeline_mode = #tpu.pipeline_mode<synchronous>, transform_indices = @transform_8, window_bounds = array<i64: 1, 32>}, {transform_indices = @transform_9, window_bounds = array<i64: 32, 32>}, {transform_indices = @transform_10, window_bounds = array<i64: 4, 4, 8, 8>}]} {
    %c0 = arith.constant 0 : index
    %c0_0 = arith.constant 0 : index
    %0 = vector.load %arg1[%c0, %c0_0] : memref<32x32xf32, #tpu.memory_space<vmem>>, vector<32x32xf32>
    %cst = arith.constant 0.000000e+00 : f32
    %1 = vector.broadcast %cst : f32 to vector<32x32xf32>
    %c0_1 = arith.constant 0 : index
    %c0_2 = arith.constant 0 : index
    %c0_3 = arith.constant 0 : index
    %2 = vector.load %arg2[%c0_1, %c0_2, %c0_3] : memref<4x32x8xf32, #tpu.memory_space<vmem>>, vector<1x32x8xf32>
    %3 = vector.shape_cast %2 : vector<1x32x8xf32> to vector<32x8xf32>
    %cst_4 = arith.constant dense<0.000000e+00> : vector<32x8xf32>
    %4 = tpu.matmul %0, %3, %cst_4 {dimension_numbers = #tpu.dot_dimension_numbers<[1], [0], [0], [1], [0, 0, 1, 1], [], []>} : vector<32x32xf32>, vector<32x8xf32>, vector<32x8xf32> -> vector<32x8xf32>
    %c0_5 = arith.constant 0 : index
    %c0_6 = arith.constant 0 : index
    %c0_7 = arith.constant 0 : index
    %5 = vector.load %arg3[%c0_5, %c0_6, %c0_7] : memref<4x1x8xf32, #tpu.memory_space<vmem>>, vector<1x1x8xf32>
    %6 = vector.shape_cast %5 : vector<1x1x8xf32> to vector<1x8xf32>
    %7 = vector.broadcast %6 : vector<1x8xf32> to vector<32x8xf32>
    %8 = arith.addf %4, %7 : vector<32x8xf32>
    %9 = vector.shape_cast %8 : vector<32x8xf32> to vector<4x8x8xf32>
    %c0_8 = arith.constant 0 : index
    %c0_9 = arith.constant 0 : index
    %c0_10 = arith.constant 0 : index
    %10 = vector.load %arg4[%c0_8, %c0_9, %c0_10] : memref<4x32x8xf32, #tpu.memory_space<vmem>>, vector<1x32x8xf32>
    %11 = vector.shape_cast %10 : vector<1x32x8xf32> to vector<32x8xf32>
    %cst_11 = arith.constant dense<0.000000e+00> : vector<32x8xf32>
    %12 = tpu.matmul %0, %11, %cst_11 {dimension_numbers = #tpu.dot_dimension_numbers<[1], [0], [0], [1], [0, 0, 1, 1], [], []>} : vector<32x32xf32>, vector<32x8xf32>, vector<32x8xf32> -> vector<32x8xf32>
    %c0_12 = arith.constant 0 : index
    %c0_13 = arith.constant 0 : index
    %c0_14 = arith.constant 0 : index
    %13 = vector.load %arg5[%c0_12, %c0_13, %c0_14] : memref<4x1x8xf32, #tpu.memory_space<vmem>>, vector<1x1x8xf32>
    %14 = vector.shape_cast %13 : vector<1x1x8xf32> to vector<1x8xf32>
    %15 = vector.broadcast %14 : vector<1x8xf32> to vector<32x8xf32>
    %16 = arith.addf %12, %15 : vector<32x8xf32>
    %17 = vector.shape_cast %16 : vector<32x8xf32> to vector<4x8x8xf32>
    %c0_15 = arith.constant 0 : index
    %c0_16 = arith.constant 0 : index
    %c0_17 = arith.constant 0 : index
    %18 = vector.load %arg6[%c0_15, %c0_16, %c0_17] : memref<4x32x8xf32, #tpu.memory_space<vmem>>, vector<1x32x8xf32>
    %19 = vector.shape_cast %18 : vector<1x32x8xf32> to vector<32x8xf32>
    %cst_18 = arith.constant dense<0.000000e+00> : vector<32x8xf32>
    %20 = tpu.matmul %0, %19, %cst_18 {dimension_numbers = #tpu.dot_dimension_numbers<[1], [0], [0], [1], [0, 0, 1, 1], [], []>} : vector<32x32xf32>, vector<32x8xf32>, vector<32x8xf32> -> vector<32x8xf32>
    %c0_19 = arith.constant 0 : index
    %c0_20 = arith.constant 0 : index
    %c0_21 = arith.constant 0 : index
    %21 = vector.load %arg7[%c0_19, %c0_20, %c0_21] : memref<4x1x8xf32, #tpu.memory_space<vmem>>, vector<1x1x8xf32>
    %22 = vector.shape_cast %21 : vector<1x1x8xf32> to vector<1x8xf32>
    %23 = vector.broadcast %22 : vector<1x8xf32> to vector<32x8xf32>
    %24 = arith.addf %20, %23 : vector<32x8xf32>
    %25 = vector.shape_cast %24 : vector<32x8xf32> to vector<4x8x8xf32>
    "tpu.trace_start"() <{level = 10 : i32, message = "bqd,bkd->bqk"}> : () -> ()
    %cst_22 = arith.constant dense<0.000000e+00> : vector<4x8x8xf32>
    %26 = tpu.matmul %9, %17, %cst_22 {dimension_numbers = #tpu.dot_dimension_numbers<[2], [2], [1], [1], [0, 0, 0, 1, 1, 1], [0], [0]>} : vector<4x8x8xf32>, vector<4x8x8xf32>, vector<4x8x8xf32> -> vector<4x8x8xf32>
    "tpu.trace_stop"() : () -> ()
    %cst_23 = arith.constant dense<0xFF800000> : vector<4x8xf32>
    %27 = vector.multi_reduction <maximumf>, %26, %cst_23 [2] : vector<4x8x8xf32> to vector<4x8xf32>
    %28 = vector.shape_cast %27 : vector<4x8xf32> to vector<4x8x1xf32>
    %29 = vector.broadcast %28 : vector<4x8x1xf32> to vector<4x8x8xf32>
    %30 = arith.subf %26, %29 : vector<4x8x8xf32>
    %31 = math.exp %30 : vector<4x8x8xf32>
    %cst_24 = arith.constant dense<0.000000e+00> : vector<4x8xf32>
    %32 = vector.multi_reduction <add>, %31, %cst_24 [2] : vector<4x8x8xf32> to vector<4x8xf32>
    %33 = vector.shape_cast %32 : vector<4x8xf32> to vector<4x8x1xf32>
    %34 = tpu.reciprocal %33 : vector<4x8x1xf32> -> vector<4x8x1xf32>
    %35 = vector.broadcast %34 : vector<4x8x1xf32> to vector<4x8x8xf32>
    %36 = arith.mulf %31, %35 : vector<4x8x8xf32>
    %c0_25 = arith.constant 0 : index
    %c0_26 = arith.constant 0 : index
    %c0_27 = arith.constant 0 : index
    %c0_28 = arith.constant 0 : index
    %37 = vector.load %arg11[%c0_25, %c0_26, %c0_27, %c0_28] : memref<4x4x8x8xf32, #tpu.memory_space<vmem>>, vector<4x1x8x8xf32>
    %38 = vector.shape_cast %37 : vector<4x1x8x8xf32> to vector<4x8x8xf32>
    %39 = vector.shape_cast %36 : vector<4x8x8xf32> to vector<4x1x8x8xf32>
    tpu.vector_store %arg11[%c0_25, %c0_26, %c0_27, %c0_28], %39 {strides = array<i32>} : memref<4x4x8x8xf32, #tpu.memory_space<vmem>>, vector<4x1x8x8xf32>,
    "tpu.trace_start"() <{level = 10 : i32, message = "bqk,bkv->bqv"}> : () -> ()
    %cst_29 = arith.constant dense<0.000000e+00> : vector<4x8x8xf32>
    %40 = tpu.matmul %36, %25, %cst_29 {dimension_numbers = #tpu.dot_dimension_numbers<[2], [1], [1], [2], [0, 0, 0, 1, 1, 2], [0], [0]>} : vector<4x8x8xf32>, vector<4x8x8xf32>, vector<4x8x8xf32> -> vector<4x8x8xf32>
    "tpu.trace_stop"() : () -> ()
    %41 = vector.shape_cast %40 : vector<4x8x8xf32> to vector<32x8xf32>
    %c0_30 = arith.constant 0 : index
    %c0_31 = arith.constant 0 : index
    %c0_32 = arith.constant 0 : index
    %42 = vector.load %arg8[%c0_30, %c0_31, %c0_32] : memref<4x8x32xf32, #tpu.memory_space<vmem>>, vector<1x8x32xf32>
    %43 = vector.shape_cast %42 : vector<1x8x32xf32> to vector<8x32xf32>
    %cst_33 = arith.constant dense<0.000000e+00> : vector<32x32xf32>
    %44 = tpu.matmul %41, %43, %cst_33 {dimension_numbers = #tpu.dot_dimension_numbers<[1], [0], [0], [1], [0, 0, 1, 1], [], []>} : vector<32x8xf32>, vector<8x32xf32>, vector<32x32xf32> -> vector<32x32xf32>
    %45 = arith.addf %1, %44 : vector<32x32xf32>
    %c1 = arith.constant 1 : index
    %c0_34 = arith.constant 0 : index
    %c0_35 = arith.constant 0 : index
    %46 = vector.load %arg2[%c1, %c0_34, %c0_35] : memref<4x32x8xf32, #tpu.memory_space<vmem>>, vector<1x32x8xf32>
    %47 = vector.shape_cast %46 : vector<1x32x8xf32> to vector<32x8xf32>
    %cst_36 = arith.constant dense<0.000000e+00> : vector<32x8xf32>
    %48 = tpu.matmul %0, %47, %cst_36 {dimension_numbers = #tpu.dot_dimension_numbers<[1], [0], [0], [1], [0, 0, 1, 1], [], []>} : vector<32x32xf32>, vector<32x8xf32>, vector<32x8xf32> -> vector<32x8xf32>
    %c1_37 = arith.constant 1 : index
    %c0_38 = arith.constant 0 : index
    %c0_39 = arith.constant 0 : index
    %49 = vector.load %arg3[%c1_37, %c0_38, %c0_39] : memref<4x1x8xf32, #tpu.memory_space<vmem>>, vector<1x1x8xf32>
    %50 = vector.shape_cast %49 : vector<1x1x8xf32> to vector<1x8xf32>
    %51 = vector.broadcast %50 : vector<1x8xf32> to vector<32x8xf32>
    %52 = arith.addf %48, %51 : vector<32x8xf32>
    %53 = vector.shape_cast %52 : vector<32x8xf32> to vector<4x8x8xf32>
    %c1_40 = arith.constant 1 : index
    %c0_41 = arith.constant 0 : index
    %c0_42 = arith.constant 0 : index
    %54 = vector.load %arg4[%c1_40, %c0_41, %c0_42] : memref<4x32x8xf32, #tpu.memory_space<vmem>>, vector<1x32x8xf32>
    %55 = vector.shape_cast %54 : vector<1x32x8xf32> to vector<32x8xf32>
    %cst_43 = arith.constant dense<0.000000e+00> : vector<32x8xf32>
    %56 = tpu.matmul %0, %55, %cst_43 {dimension_numbers = #tpu.dot_dimension_numbers<[1], [0], [0], [1], [0, 0, 1, 1], [], []>} : vector<32x32xf32>, vector<32x8xf32>, vector<32x8xf32> -> vector<32x8xf32>
    %c1_44 = arith.constant 1 : index
    %c0_45 = arith.constant 0 : index
    %c0_46 = arith.constant 0 : index
    %57 = vector.load %arg5[%c1_44, %c0_45, %c0_46] : memref<4x1x8xf32, #tpu.memory_space<vmem>>, vector<1x1x8xf32>
    %58 = vector.shape_cast %57 : vector<1x1x8xf32> to vector<1x8xf32>
    %59 = vector.broadcast %58 : vector<1x8xf32> to vector<32x8xf32>
    %60 = arith.addf %56, %59 : vector<32x8xf32>
    %61 = vector.shape_cast %60 : vector<32x8xf32> to vector<4x8x8xf32>
    %c1_47 = arith.constant 1 : index
    %c0_48 = arith.constant 0 : index
    %c0_49 = arith.constant 0 : index
    %62 = vector.load %arg6[%c1_47, %c0_48, %c0_49] : memref<4x32x8xf32, #tpu.memory_space<vmem>>, vector<1x32x8xf32>
    %63 = vector.shape_cast %62 : vector<1x32x8xf32> to vector<32x8xf32>
    %cst_50 = arith.constant dense<0.000000e+00> : vector<32x8xf32>
    %64 = tpu.matmul %0, %63, %cst_50 {dimension_numbers = #tpu.dot_dimension_numbers<[1], [0], [0], [1], [0, 0, 1, 1], [], []>} : vector<32x32xf32>, vector<32x8xf32>, vector<32x8xf32> -> vector<32x8xf32>
    %c1_51 = arith.constant 1 : index
    %c0_52 = arith.constant 0 : index
    %c0_53 = arith.constant 0 : index
    %65 = vector.load %arg7[%c1_51, %c0_52, %c0_53] : memref<4x1x8xf32, #tpu.memory_space<vmem>>, vector<1x1x8xf32>
    %66 = vector.shape_cast %65 : vector<1x1x8xf32> to vector<1x8xf32>
    %67 = vector.broadcast %66 : vector<1x8xf32> to vector<32x8xf32>
    %68 = arith.addf %64, %67 : vector<32x8xf32>
    %69 = vector.shape_cast %68 : vector<32x8xf32> to vector<4x8x8xf32>
    "tpu.trace_start"() <{level = 10 : i32, message = "bqd,bkd->bqk"}> : () -> ()
    %cst_54 = arith.constant dense<0.000000e+00> : vector<4x8x8xf32>
    %70 = tpu.matmul %53, %61, %cst_54 {dimension_numbers = #tpu.dot_dimension_numbers<[2], [2], [1], [1], [0, 0, 0, 1, 1, 1], [0], [0]>} : vector<4x8x8xf32>, vector<4x8x8xf32>, vector<4x8x8xf32> -> vector<4x8x8xf32>
    "tpu.trace_stop"() : () -> ()
    %cst_55 = arith.constant dense<0xFF800000> : vector<4x8xf32>
    %71 = vector.multi_reduction <maximumf>, %70, %cst_55 [2] : vector<4x8x8xf32> to vector<4x8xf32>
    %72 = vector.shape_cast %71 : vector<4x8xf32> to vector<4x8x1xf32>
    %73 = vector.broadcast %72 : vector<4x8x1xf32> to vector<4x8x8xf32>
    %74 = arith.subf %70, %73 : vector<4x8x8xf32>
    %75 = math.exp %74 : vector<4x8x8xf32>
    %cst_56 = arith.constant dense<0.000000e+00> : vector<4x8xf32>
    %76 = vector.multi_reduction <add>, %75, %cst_56 [2] : vector<4x8x8xf32> to vector<4x8xf32>
    %77 = vector.shape_cast %76 : vector<4x8xf32> to vector<4x8x1xf32>
    %78 = tpu.reciprocal %77 : vector<4x8x1xf32> -> vector<4x8x1xf32>
    %79 = vector.broadcast %78 : vector<4x8x1xf32> to vector<4x8x8xf32>
    %80 = arith.mulf %75, %79 : vector<4x8x8xf32>
    %c0_57 = arith.constant 0 : index
    %c1_58 = arith.constant 1 : index
    %c0_59 = arith.constant 0 : index
    %c0_60 = arith.constant 0 : index
    %81 = vector.load %arg11[%c0_57, %c1_58, %c0_59, %c0_60] : memref<4x4x8x8xf32, #tpu.memory_space<vmem>>, vector<4x1x8x8xf32>
    %82 = vector.shape_cast %81 : vector<4x1x8x8xf32> to vector<4x8x8xf32>
    %83 = vector.shape_cast %80 : vector<4x8x8xf32> to vector<4x1x8x8xf32>
    tpu.vector_store %arg11[%c0_57, %c1_58, %c0_59, %c0_60], %83 {strides = array<i32>} : memref<4x4x8x8xf32, #tpu.memory_space<vmem>>, vector<4x1x8x8xf32>,
    "tpu.trace_start"() <{level = 10 : i32, message = "bqk,bkv->bqv"}> : () -> ()
    %cst_61 = arith.constant dense<0.000000e+00> : vector<4x8x8xf32>
    %84 = tpu.matmul %80, %69, %cst_61 {dimension_numbers = #tpu.dot_dimension_numbers<[2], [1], [1], [2], [0, 0, 0, 1, 1, 2], [0], [0]>} : vector<4x8x8xf32>, vector<4x8x8xf32>, vector<4x8x8xf32> -> vector<4x8x8xf32>
    "tpu.trace_stop"() : () -> ()
    %85 = vector.shape_cast %84 : vector<4x8x8xf32> to vector<32x8xf32>
    %c1_62 = arith.constant 1 : index
    %c0_63 = arith.constant 0 : index
    %c0_64 = arith.constant 0 : index
    %86 = vector.load %arg8[%c1_62, %c0_63, %c0_64] : memref<4x8x32xf32, #tpu.memory_space<vmem>>, vector<1x8x32xf32>
    %87 = vector.shape_cast %86 : vector<1x8x32xf32> to vector<8x32xf32>
    %cst_65 = arith.constant dense<0.000000e+00> : vector<32x32xf32>
    %88 = tpu.matmul %85, %87, %cst_65 {dimension_numbers = #tpu.dot_dimension_numbers<[1], [0], [0], [1], [0, 0, 1, 1], [], []>} : vector<32x8xf32>, vector<8x32xf32>, vector<32x32xf32> -> vector<32x32xf32>
    %89 = arith.addf %45, %88 : vector<32x32xf32>
    %c2 = arith.constant 2 : index
    %c0_66 = arith.constant 0 : index
    %c0_67 = arith.constant 0 : index
    %90 = vector.load %arg2[%c2, %c0_66, %c0_67] : memref<4x32x8xf32, #tpu.memory_space<vmem>>, vector<1x32x8xf32>
    %91 = vector.shape_cast %90 : vector<1x32x8xf32> to vector<32x8xf32>
    %cst_68 = arith.constant dense<0.000000e+00> : vector<32x8xf32>
    %92 = tpu.matmul %0, %91, %cst_68 {dimension_numbers = #tpu.dot_dimension_numbers<[1], [0], [0], [1], [0, 0, 1, 1], [], []>} : vector<32x32xf32>, vector<32x8xf32>, vector<32x8xf32> -> vector<32x8xf32>
    %c2_69 = arith.constant 2 : index
    %c0_70 = arith.constant 0 : index
    %c0_71 = arith.constant 0 : index
    %93 = vector.load %arg3[%c2_69, %c0_70, %c0_71] : memref<4x1x8xf32, #tpu.memory_space<vmem>>, vector<1x1x8xf32>
    %94 = vector.shape_cast %93 : vector<1x1x8xf32> to vector<1x8xf32>
    %95 = vector.broadcast %94 : vector<1x8xf32> to vector<32x8xf32>
    %96 = arith.addf %92, %95 : vector<32x8xf32>
    %97 = vector.shape_cast %96 : vector<32x8xf32> to vector<4x8x8xf32>
    %c2_72 = arith.constant 2 : index
    %c0_73 = arith.constant 0 : index
    %c0_74 = arith.constant 0 : index
    %98 = vector.load %arg4[%c2_72, %c0_73, %c0_74] : memref<4x32x8xf32, #tpu.memory_space<vmem>>, vector<1x32x8xf32>
    %99 = vector.shape_cast %98 : vector<1x32x8xf32> to vector<32x8xf32>
    %cst_75 = arith.constant dense<0.000000e+00> : vector<32x8xf32>
    %100 = tpu.matmul %0, %99, %cst_75 {dimension_numbers = #tpu.dot_dimension_numbers<[1], [0], [0], [1], [0, 0, 1, 1], [], []>} : vector<32x32xf32>, vector<32x8xf32>, vector<32x8xf32> -> vector<32x8xf32>
    %c2_76 = arith.constant 2 : index
    %c0_77 = arith.constant 0 : index
    %c0_78 = arith.constant 0 : index
    %101 = vector.load %arg5[%c2_76, %c0_77, %c0_78] : memref<4x1x8xf32, #tpu.memory_space<vmem>>, vector<1x1x8xf32>
    %102 = vector.shape_cast %101 : vector<1x1x8xf32> to vector<1x8xf32>
    %103 = vector.broadcast %102 : vector<1x8xf32> to vector<32x8xf32>
    %104 = arith.addf %100, %103 : vector<32x8xf32>
    %105 = vector.shape_cast %104 : vector<32x8xf32> to vector<4x8x8xf32>
    %c2_79 = arith.constant 2 : index
    %c0_80 = arith.constant 0 : index
    %c0_81 = arith.constant 0 : index
    %106 = vector.load %arg6[%c2_79, %c0_80, %c0_81] : memref<4x32x8xf32, #tpu.memory_space<vmem>>, vector<1x32x8xf32>
    %107 = vector.shape_cast %106 : vector<1x32x8xf32> to vector<32x8xf32>
    %cst_82 = arith.constant dense<0.000000e+00> : vector<32x8xf32>
    %108 = tpu.matmul %0, %107, %cst_82 {dimension_numbers = #tpu.dot_dimension_numbers<[1], [0], [0], [1], [0, 0, 1, 1], [], []>} : vector<32x32xf32>, vector<32x8xf32>, vector<32x8xf32> -> vector<32x8xf32>
    %c2_83 = arith.constant 2 : index
    %c0_84 = arith.constant 0 : index
    %c0_85 = arith.constant 0 : index
    %109 = vector.load %arg7[%c2_83, %c0_84, %c0_85] : memref<4x1x8xf32, #tpu.memory_space<vmem>>, vector<1x1x8xf32>
    %110 = vector.shape_cast %109 : vector<1x1x8xf32> to vector<1x8xf32>
    %111 = vector.broadcast %110 : vector<1x8xf32> to vector<32x8xf32>
    %112 = arith.addf %108, %111 : vector<32x8xf32>
    %113 = vector.shape_cast %112 : vector<32x8xf32> to vector<4x8x8xf32>
    "tpu.trace_start"() <{level = 10 : i32, message = "bqd,bkd->bqk"}> : () -> ()
    %cst_86 = arith.constant dense<0.000000e+00> : vector<4x8x8xf32>
    %114 = tpu.matmul %97, %105, %cst_86 {dimension_numbers = #tpu.dot_dimension_numbers<[2], [2], [1], [1], [0, 0, 0, 1, 1, 1], [0], [0]>} : vector<4x8x8xf32>, vector<4x8x8xf32>, vector<4x8x8xf32> -> vector<4x8x8xf32>
    "tpu.trace_stop"() : () -> ()
    %cst_87 = arith.constant dense<0xFF800000> : vector<4x8xf32>
    %115 = vector.multi_reduction <maximumf>, %114, %cst_87 [2] : vector<4x8x8xf32> to vector<4x8xf32>
    %116 = vector.shape_cast %115 : vector<4x8xf32> to vector<4x8x1xf32>
    %117 = vector.broadcast %116 : vector<4x8x1xf32> to vector<4x8x8xf32>
    %118 = arith.subf %114, %117 : vector<4x8x8xf32>
    %119 = math.exp %118 : vector<4x8x8xf32>
    %cst_88 = arith.constant dense<0.000000e+00> : vector<4x8xf32>
    %120 = vector.multi_reduction <add>, %119, %cst_88 [2] : vector<4x8x8xf32> to vector<4x8xf32>
    %121 = vector.shape_cast %120 : vector<4x8xf32> to vector<4x8x1xf32>
    %122 = tpu.reciprocal %121 : vector<4x8x1xf32> -> vector<4x8x1xf32>
    %123 = vector.broadcast %122 : vector<4x8x1xf32> to vector<4x8x8xf32>
    %124 = arith.mulf %119, %123 : vector<4x8x8xf32>
    %c0_89 = arith.constant 0 : index
    %c2_90 = arith.constant 2 : index
    %c0_91 = arith.constant 0 : index
    %c0_92 = arith.constant 0 : index
    %125 = vector.load %arg11[%c0_89, %c2_90, %c0_91, %c0_92] : memref<4x4x8x8xf32, #tpu.memory_space<vmem>>, vector<4x1x8x8xf32>
    %126 = vector.shape_cast %125 : vector<4x1x8x8xf32> to vector<4x8x8xf32>
    %127 = vector.shape_cast %124 : vector<4x8x8xf32> to vector<4x1x8x8xf32>
    tpu.vector_store %arg11[%c0_89, %c2_90, %c0_91, %c0_92], %127 {strides = array<i32>} : memref<4x4x8x8xf32, #tpu.memory_space<vmem>>, vector<4x1x8x8xf32>,
    "tpu.trace_start"() <{level = 10 : i32, message = "bqk,bkv->bqv"}> : () -> ()
    %cst_93 = arith.constant dense<0.000000e+00> : vector<4x8x8xf32>
    %128 = tpu.matmul %124, %113, %cst_93 {dimension_numbers = #tpu.dot_dimension_numbers<[2], [1], [1], [2], [0, 0, 0, 1, 1, 2], [0], [0]>} : vector<4x8x8xf32>, vector<4x8x8xf32>, vector<4x8x8xf32> -> vector<4x8x8xf32>
    "tpu.trace_stop"() : () -> ()
    %129 = vector.shape_cast %128 : vector<4x8x8xf32> to vector<32x8xf32>
    %c2_94 = arith.constant 2 : index
    %c0_95 = arith.constant 0 : index
    %c0_96 = arith.constant 0 : index
    %130 = vector.load %arg8[%c2_94, %c0_95, %c0_96] : memref<4x8x32xf32, #tpu.memory_space<vmem>>, vector<1x8x32xf32>
    %131 = vector.shape_cast %130 : vector<1x8x32xf32> to vector<8x32xf32>
    %cst_97 = arith.constant dense<0.000000e+00> : vector<32x32xf32>
    %132 = tpu.matmul %129, %131, %cst_97 {dimension_numbers = #tpu.dot_dimension_numbers<[1], [0], [0], [1], [0, 0, 1, 1], [], []>} : vector<32x8xf32>, vector<8x32xf32>, vector<32x32xf32> -> vector<32x32xf32>
    %133 = arith.addf %89, %132 : vector<32x32xf32>
    %c3 = arith.constant 3 : index
    %c0_98 = arith.constant 0 : index
    %c0_99 = arith.constant 0 : index
    %134 = vector.load %arg2[%c3, %c0_98, %c0_99] : memref<4x32x8xf32, #tpu.memory_space<vmem>>, vector<1x32x8xf32>
    %135 = vector.shape_cast %134 : vector<1x32x8xf32> to vector<32x8xf32>
    %cst_100 = arith.constant dense<0.000000e+00> : vector<32x8xf32>
    %136 = tpu.matmul %0, %135, %cst_100 {dimension_numbers = #tpu.dot_dimension_numbers<[1], [0], [0], [1], [0, 0, 1, 1], [], []>} : vector<32x32xf32>, vector<32x8xf32>, vector<32x8xf32> -> vector<32x8xf32>
    %c3_101 = arith.constant 3 : index
    %c0_102 = arith.constant 0 : index
    %c0_103 = arith.constant 0 : index
    %137 = vector.load %arg3[%c3_101, %c0_102, %c0_103] : memref<4x1x8xf32, #tpu.memory_space<vmem>>, vector<1x1x8xf32>
    %138 = vector.shape_cast %137 : vector<1x1x8xf32> to vector<1x8xf32>
    %139 = vector.broadcast %138 : vector<1x8xf32> to vector<32x8xf32>
    %140 = arith.addf %136, %139 : vector<32x8xf32>
    %141 = vector.shape_cast %140 : vector<32x8xf32> to vector<4x8x8xf32>
    %c3_104 = arith.constant 3 : index
    %c0_105 = arith.constant 0 : index
    %c0_106 = arith.constant 0 : index
    %142 = vector.load %arg4[%c3_104, %c0_105, %c0_106] : memref<4x32x8xf32, #tpu.memory_space<vmem>>, vector<1x32x8xf32>
    %143 = vector.shape_cast %142 : vector<1x32x8xf32> to vector<32x8xf32>
    %cst_107 = arith.constant dense<0.000000e+00> : vector<32x8xf32>
    %144 = tpu.matmul %0, %143, %cst_107 {dimension_numbers = #tpu.dot_dimension_numbers<[1], [0], [0], [1], [0, 0, 1, 1], [], []>} : vector<32x32xf32>, vector<32x8xf32>, vector<32x8xf32> -> vector<32x8xf32>
    %c3_108 = arith.constant 3 : index
    %c0_109 = arith.constant 0 : index
    %c0_110 = arith.constant 0 : index
    %145 = vector.load %arg5[%c3_108, %c0_109, %c0_110] : memref<4x1x8xf32, #tpu.memory_space<vmem>>, vector<1x1x8xf32>
    %146 = vector.shape_cast %145 : vector<1x1x8xf32> to vector<1x8xf32>
    %147 = vector.broadcast %146 : vector<1x8xf32> to vector<32x8xf32>
    %148 = arith.addf %144, %147 : vector<32x8xf32>
    %149 = vector.shape_cast %148 : vector<32x8xf32> to vector<4x8x8xf32>
    %c3_111 = arith.constant 3 : index
    %c0_112 = arith.constant 0 : index
    %c0_113 = arith.constant 0 : index
    %150 = vector.load %arg6[%c3_111, %c0_112, %c0_113] : memref<4x32x8xf32, #tpu.memory_space<vmem>>, vector<1x32x8xf32>
    %151 = vector.shape_cast %150 : vector<1x32x8xf32> to vector<32x8xf32>
    %cst_114 = arith.constant dense<0.000000e+00> : vector<32x8xf32>
    %152 = tpu.matmul %0, %151, %cst_114 {dimension_numbers = #tpu.dot_dimension_numbers<[1], [0], [0], [1], [0, 0, 1, 1], [], []>} : vector<32x32xf32>, vector<32x8xf32>, vector<32x8xf32> -> vector<32x8xf32>
    %c3_115 = arith.constant 3 : index
    %c0_116 = arith.constant 0 : index
    %c0_117 = arith.constant 0 : index
    %153 = vector.load %arg7[%c3_115, %c0_116, %c0_117] : memref<4x1x8xf32, #tpu.memory_space<vmem>>, vector<1x1x8xf32>
    %154 = vector.shape_cast %153 : vector<1x1x8xf32> to vector<1x8xf32>
    %155 = vector.broadcast %154 : vector<1x8xf32> to vector<32x8xf32>
    %156 = arith.addf %152, %155 : vector<32x8xf32>
    %157 = vector.shape_cast %156 : vector<32x8xf32> to vector<4x8x8xf32>
    "tpu.trace_start"() <{level = 10 : i32, message = "bqd,bkd->bqk"}> : () -> ()
    %cst_118 = arith.constant dense<0.000000e+00> : vector<4x8x8xf32>
    %158 = tpu.matmul %141, %149, %cst_118 {dimension_numbers = #tpu.dot_dimension_numbers<[2], [2], [1], [1], [0, 0, 0, 1, 1, 1], [0], [0]>} : vector<4x8x8xf32>, vector<4x8x8xf32>, vector<4x8x8xf32> -> vector<4x8x8xf32>
    "tpu.trace_stop"() : () -> ()
    %cst_119 = arith.constant dense<0xFF800000> : vector<4x8xf32>
    %159 = vector.multi_reduction <maximumf>, %158, %cst_119 [2] : vector<4x8x8xf32> to vector<4x8xf32>
    %160 = vector.shape_cast %159 : vector<4x8xf32> to vector<4x8x1xf32>
    %161 = vector.broadcast %160 : vector<4x8x1xf32> to vector<4x8x8xf32>
    %162 = arith.subf %158, %161 : vector<4x8x8xf32>
    %163 = math.exp %162 : vector<4x8x8xf32>
    %cst_120 = arith.constant dense<0.000000e+00> : vector<4x8xf32>
    %164 = vector.multi_reduction <add>, %163, %cst_120 [2] : vector<4x8x8xf32> to vector<4x8xf32>
    %165 = vector.shape_cast %164 : vector<4x8xf32> to vector<4x8x1xf32>
    %166 = tpu.reciprocal %165 : vector<4x8x1xf32> -> vector<4x8x1xf32>
    %167 = vector.broadcast %166 : vector<4x8x1xf32> to vector<4x8x8xf32>
    %168 = arith.mulf %163, %167 : vector<4x8x8xf32>
    %c0_121 = arith.constant 0 : index
    %c3_122 = arith.constant 3 : index
    %c0_123 = arith.constant 0 : index
    %c0_124 = arith.constant 0 : index
    %169 = vector.load %arg11[%c0_121, %c3_122, %c0_123, %c0_124] : memref<4x4x8x8xf32, #tpu.memory_space<vmem>>, vector<4x1x8x8xf32>
    %170 = vector.shape_cast %169 : vector<4x1x8x8xf32> to vector<4x8x8xf32>
    %171 = vector.shape_cast %168 : vector<4x8x8xf32> to vector<4x1x8x8xf32>
    tpu.vector_store %arg11[%c0_121, %c3_122, %c0_123, %c0_124], %171 {strides = array<i32>} : memref<4x4x8x8xf32, #tpu.memory_space<vmem>>, vector<4x1x8x8xf32>,
    "tpu.trace_start"() <{level = 10 : i32, message = "bqk,bkv->bqv"}> : () -> ()
    %cst_125 = arith.constant dense<0.000000e+00> : vector<4x8x8xf32>
    %172 = tpu.matmul %168, %157, %cst_125 {dimension_numbers = #tpu.dot_dimension_numbers<[2], [1], [1], [2], [0, 0, 0, 1, 1, 2], [0], [0]>} : vector<4x8x8xf32>, vector<4x8x8xf32>, vector<4x8x8xf32> -> vector<4x8x8xf32>
    "tpu.trace_stop"() : () -> ()
    %173 = vector.shape_cast %172 : vector<4x8x8xf32> to vector<32x8xf32>
    %c3_126 = arith.constant 3 : index
    %c0_127 = arith.constant 0 : index
    %c0_128 = arith.constant 0 : index
    %174 = vector.load %arg8[%c3_126, %c0_127, %c0_128] : memref<4x8x32xf32, #tpu.memory_space<vmem>>, vector<1x8x32xf32>
    %175 = vector.shape_cast %174 : vector<1x8x32xf32> to vector<8x32xf32>
    %cst_129 = arith.constant dense<0.000000e+00> : vector<32x32xf32>
    %176 = tpu.matmul %173, %175, %cst_129 {dimension_numbers = #tpu.dot_dimension_numbers<[1], [0], [0], [1], [0, 0, 1, 1], [], []>} : vector<32x8xf32>, vector<8x32xf32>, vector<32x32xf32> -> vector<32x32xf32>
    %177 = arith.addf %133, %176 : vector<32x32xf32>
    %c0_130 = arith.constant 0 : index
    %c0_131 = arith.constant 0 : index
    %178 = vector.load %arg9[%c0_130, %c0_131] : memref<1x32xf32, #tpu.memory_space<vmem>>, vector<1x32xf32>
    %179 = vector.broadcast %178 : vector<1x32xf32> to vector<32x32xf32>
    %180 = arith.addf %177, %179 : vector<32x32xf32>
    %c0_132 = arith.constant 0 : index
    %c0_133 = arith.constant 0 : index
    %181 = vector.load %arg10[%c0_132, %c0_133] : memref<32x32xf32, #tpu.memory_space<vmem>>, vector<32x32xf32>
    tpu.vector_store %arg10[%c0_132, %c0_133], %180 {strides = array<i32>} : memref<32x32xf32, #tpu.memory_space<vmem>>, vector<32x32xf32>,
    return
  }
  func.func @transform_0(%arg0: i32) -> (i32, i32) {
    %c0_i32 = arith.constant 0 : i32
    %c0_i32_0 = arith.constant 0 : i32
    return %arg0, %c0_i32 : i32, i32
  }
  func.func @transform_1(%arg0: i32) -> (i32, i32, i32) {
    %c0_i32 = arith.constant 0 : i32
    %c0_i32_0 = arith.constant 0 : i32
    %c0_i32_1 = arith.constant 0 : i32
    %c0_i32_2 = arith.constant 0 : i32
    return %c0_i32, %c0_i32_0, %c0_i32_1 : i32, i32, i32
  }
  func.func @transform_2(%arg0: i32) -> (i32, i32, i32) {
    %c0_i32 = arith.constant 0 : i32
    %c0_i32_0 = arith.constant 0 : i32
    %c0_i32_1 = arith.constant 0 : i32
    %c0_i32_2 = arith.constant 0 : i32
    return %c0_i32, %c0_i32_0, %c0_i32_1 : i32, i32, i32
  }
  func.func @transform_3(%arg0: i32) -> (i32, i32, i32) {
    %c0_i32 = arith.constant 0 : i32
    %c0_i32_0 = arith.constant 0 : i32
    %c0_i32_1 = arith.constant 0 : i32
    %c0_i32_2 = arith.constant 0 : i32
    return %c0_i32, %c0_i32_0, %c0_i32_1 : i32, i32, i32
  }
  func.func @transform_4(%arg0: i32) -> (i32, i32, i32) {
    %c0_i32 = arith.constant 0 : i32
    %c0_i32_0 = arith.constant 0 : i32
    %c0_i32_1 = arith.constant 0 : i32
    %c0_i32_2 = arith.constant 0 : i32
    return %c0_i32, %c0_i32_0, %c0_i32_1 : i32, i32, i32
  }
  func.func @transform_5(%arg0: i32) -> (i32, i32, i32) {
    %c0_i32 = arith.constant 0 : i32
    %c0_i32_0 = arith.constant 0 : i32
    %c0_i32_1 = arith.constant 0 : i32
    %c0_i32_2 = arith.constant 0 : i32
    return %c0_i32, %c0_i32_0, %c0_i32_1 : i32, i32, i32
  }
  func.func @transform_6(%arg0: i32) -> (i32, i32, i32) {
    %c0_i32 = arith.constant 0 : i32
    %c0_i32_0 = arith.constant 0 : i32
    %c0_i32_1 = arith.constant 0 : i32
    %c0_i32_2 = arith.constant 0 : i32
    return %c0_i32, %c0_i32_0, %c0_i32_1 : i32, i32, i32
  }
  func.func @transform_7(%arg0: i32) -> (i32, i32, i32) {
    %c0_i32 = arith.constant 0 : i32
    %c0_i32_0 = arith.constant 0 : i32
    %c0_i32_1 = arith.constant 0 : i32
    %c0_i32_2 = arith.constant 0 : i32
    return %c0_i32, %c0_i32_0, %c0_i32_1 : i32, i32, i32
  }
  func.func @transform_8(%arg0: i32) -> (i32, i32) {
    %c0_i32 = arith.constant 0 : i32
    %c0_i32_0 = arith.constant 0 : i32
    %c0_i32_1 = arith.constant 0 : i32
    return %c0_i32, %c0_i32_0 : i32, i32
  }
  func.func @transform_9(%arg0: i32) -> (i32, i32) {
    %c0_i32 = arith.constant 0 : i32
    %c0_i32_0 = arith.constant 0 : i32
    return %arg0, %c0_i32 : i32, i32
  }
  func.func @transform_10(%arg0: i32) -> (i32, i32, i32, i32) {
    %c0_i32 = arith.constant 0 : i32
    %c0_i32_0 = arith.constant 0 : i32
    %c0_i32_1 = arith.constant 0 : i32
    %c0_i32_2 = arith.constant 0 : i32
    return %arg0, %c0_i32, %c0_i32_0, %c0_i32_1 : i32, i32, i32, i32
  }
}

</mosaic_0001>

<bundles_post_ra>
// kernel: tpu_custom_call.1
= control target key start
LH: loop header
LB: loop body
LE: loop exit
PB: predicated region body
PF: predicated region fallthrough
CT: control target
= control target key end

     0   :  { %16 = vsyncpa [#allocation3], 0  ;;  %s6101_s0 = inlined_call_operand.hbm [shape: f32[32,32], index: 0, kind: input, shape index: {}]   ;;  %s6102_s1 = inlined_call_operand.hbm [shape: f32[4,32,8], index: 1, kind: input, shape index: {}]   ;;  %s6103_s2 = inlined_call_operand.hbm [shape: f32[4,1,8], index: 2, kind: input, shape index: {}]   ;;  %s6104_s3 = inlined_call_operand.hbm [shape: f32[4,32,8], index: 3, kind: input, shape index: {}]   ;;  %s6105_s4 = inlined_call_operand.hbm [shape: f32[4,1,8], index: 4, kind: input, shape index: {}]   ;;  %s6106_s5 = inlined_call_operand.hbm [shape: f32[4,32,8], index: 5, kind: input, shape index: {}]   ;;  %s6107_s6 = inlined_call_operand.hbm [shape: f32[4,1,8], index: 6, kind: input, shape index: {}]   ;;  %s6108_s7 = inlined_call_operand.hbm [shape: f32[4,8,32], index: 7, kind: input, shape index: {}]   ;;  %s6109_s8 = inlined_call_operand.hbm [shape: f32[1,32], index: 8, kind: input, shape index: {}]   ;;  %s6110_s9 = inlined_call_operand.hbm [shape: f32[32,32], index: 9, kind: output, shape index: {0}]   ;;  %s6111_s10 = inlined_call_operand.hbm [shape: f32[4,4,8,8], index: 10, kind: output, shape index: {1}]  }
   0x1   :  { %17 = vsyncpa [#allocation6], 0 }
   0x2   :  { %18 = vsyncpa [#allocation9], 0 }
   0x3   :  { %19 = vsyncpa [#allocation12], 0 }
   0x4   :  { %20 = vsyncpa [#allocation15], 0 }
   0x5   :  { %21 = vsyncpa [#allocation4], 0 }
   0x6   :  { %22 = vsyncpa [#allocation19], 0  ;;  %s5496_s13 = smov [#allocation5]   ;;  %s5497_s15 = smov [#allocation8]  }
   0x7   :  { %s40_s14 = sshll.u32 %s5496_s13, 4  ;;  %s64_s16 = sshll.u32 %s5497_s15, 4  ;;  %s41_s14 = int_to_ptr.vmem [resolvable:$true] %s40_s14  ;;  %s5568_s16 = int_to_ptr.vmem [resolvable:$true] %s64_s16 }
   0x8   :  { %s5240_s19 = scalar_lea.hbm %s6102_s1, 2048 }
   0x9   :  { %p5241_p0 = scmp.ne.s32.totalorder %s6102_s1, %s5240_s19  ;;  %p5244_p1 = scmp.lt.u32.totalorder %s5240_s19, %s6102_s1 }
   0xb   :  { %p5246_p2 = pnand %p5244_p1, %p5241_p0 }
   0xd   :  { %5249 = shalt.err (!%p5246_p2)
}
   0xe   :  { %s5250_s24 = scalar_lea.vmem %s41_s14, 2048  ;;  %p5255_p4 = scmp.lt.s32.totalorder %s41_s14, %s41_s14 }
   0xf   :  { %p5251_p3 = scmp.ne.s32.totalorder %s41_s14, %s5250_s24  ;;  %p5256_p5 = scmp.lt.s32.totalorder %s5250_s24, %s5250_s24 }
  0x11   :  { %p5257_p6 = por %p5256_p5, %p5255_p4 }
  0x13   :  { %p5258_p7 = pnand %p5257_p6, %p5251_p3 }
  0x15   :  { %5261 = shalt.err (!%p5258_p7)
}
  0x16   :  { %s5498_s25 = smov 128   ;;  %s5499_s26 = smov 8  }
  0x17   :  { %46 = dma.hbm_to_vmem [thread:$0]  %s6102_s1, 2048, %s41_s14, [#allocation6], %s5498_s25, %s5498_s25, %s5499_s26  }
  0x18   :  { %s5262_s11 = scalar_lea.hbm %s6104_s3, 2048 }
  0x19   :  { %p5263_p8 = scmp.ne.s32.totalorder %s6104_s3, %s5262_s11  ;;  %p5266_p9 = scmp.lt.u32.totalorder %s5262_s11, %s6104_s3 }
  0x1b   :  { %p5268_p10 = pnand %p5266_p9, %p5263_p8 }
  0x1d   :  { %5271 = shalt.err (!%p5268_p10)
}
  0x1e   :  { %s5272_s18 = scalar_lea.vmem %s5568_s16, 2048  ;;  %p5277_p12 = scmp.lt.s32.totalorder %s5568_s16, %s5568_s16 }
  0x1f   :  { %p5273_p11 = scmp.ne.s32.totalorder %s5568_s16, %s5272_s18  ;;  %p5278_p13 = scmp.lt.s32.totalorder %s5272_s18, %s5272_s18 }
  0x21   :  { %p5279_p0 = por %p5278_p13, %p5277_p12 }
  0x23   :  { %p5280_p1 = pnand %p5279_p0, %p5273_p11 }
  0x25   :  { %5283 = shalt.err (!%p5280_p1)
}
  0x26   :  { %70 = dma.hbm_to_vmem [thread:$0]  %s6104_s3, 2048, %s5568_s16, [#allocation9], %s5498_s25, %s5498_s25, %s5499_s26  }
  0x27   :  { %s5500_s19 = smov [#allocation11]   ;;  %s5501_s21 = smov [#allocation14]  }
  0x28   :  { %s88_s20 = sshll.u32 %s5500_s19, 4  ;;  %s112_s22 = sshll.u32 %s5501_s21, 4  ;;  %s89_s20 = int_to_ptr.vmem [resolvable:$true] %s88_s20  ;;  %s5605_s22 = int_to_ptr.vmem [resolvable:$true] %s112_s22 }
  0x29   :  { %s5284_s27 = scalar_lea.hbm %s6106_s5, 2048 }
  0x2a   :  { %p5285_p2 = scmp.ne.s32.totalorder %s6106_s5, %s5284_s27  ;;  %p5288_p3 = scmp.lt.u32.totalorder %s5284_s27, %s6106_s5 }
  0x2c   :  { %p5290_p4 = pnand %p5288_p3, %p5285_p2 }
  0x2e   :  { %5293 = shalt.err (!%p5290_p4)
}
  0x2f   :  { %s5294_s3 = scalar_lea.vmem %s89_s20, 2048  ;;  %p5299_p6 = scmp.lt.s32.totalorder %s89_s20, %s89_s20 }
  0x30   :  { %p5295_p5 = scmp.ne.s32.totalorder %s89_s20, %s5294_s3  ;;  %p5300_p7 = scmp.lt.s32.totalorder %s5294_s3, %s5294_s3 }
  0x32   :  { %p5301_p8 = por %p5300_p7, %p5299_p6 }
  0x34   :  { %p5302_p9 = pnand %p5301_p8, %p5295_p5 }
  0x36   :  { %5305 = shalt.err (!%p5302_p9)
}
  0x37   :  { %94 = dma.hbm_to_vmem [thread:$0]  %s6106_s5, 2048, %s89_s20, [#allocation12], %s5498_s25, %s5498_s25, %s5499_s26  }
  0x38   :  { %s5306_s17 = scalar_lea.hbm %s6108_s7, 512 }
  0x39   :  { %p5307_p10 = scmp.ne.s32.totalorder %s6108_s7, %s5306_s17  ;;  %p5310_p11 = scmp.lt.u32.totalorder %s5306_s17, %s6108_s7 }
  0x3b   :  { %p5312_p12 = pnand %p5310_p11, %p5307_p10 }
  0x3d   :  { %5315 = shalt.err (!%p5312_p12)
}
  0x3e   :  { %s5316_s21 = scalar_lea.vmem %s5605_s22, 512  ;;  %p5321_p0 = scmp.lt.s32.totalorder %s5605_s22, %s5605_s22 }
  0x3f   :  { %p5317_p13 = scmp.ne.s32.totalorder %s5605_s22, %s5316_s21  ;;  %p5322_p1 = scmp.lt.s32.totalorder %s5316_s21, %s5316_s21 }
  0x41   :  { %p5323_p2 = por %p5322_p1, %p5321_p0 }
  0x43   :  { %p5324_p3 = pnand %p5323_p2, %p5317_p13 }
  0x45   :  { %5327 = shalt.err (!%p5324_p3)
}
  0x46   :  { %118 = dma.hbm_to_vmem [thread:$0]  %s6108_s7, 512, %s5605_s22, [#allocation15], %s5498_s25, %s5498_s25, %s5499_s26  }
  0x47   :  { %s5502_s23 = smov [#allocation2]   ;;  %s5503_s27 = smov [#allocation7]  }
  0x48   :  { %s28_s24 = sshll.u32 %s5502_s23, 4  ;;  %s52_s28 = sshll.u32 %s5503_s27, 4  ;;  %s29_s24 = int_to_ptr.vmem [resolvable:$true] %s28_s24  ;;  %s5642_s28 = int_to_ptr.vmem [resolvable:$true] %s52_s28 }
  0x49   :  { %s5328_s11 = scalar_lea.hbm %s6101_s0, 512 }
  0x4a   :  { %p5329_p4 = scmp.ne.s32.totalorder %s6101_s0, %s5328_s11  ;;  %p5332_p5 = scmp.lt.u32.totalorder %s5328_s11, %s6101_s0 }
  0x4c   :  { %p5334_p6 = pnand %p5332_p5, %p5329_p4 }
  0x4e   :  { %5337 = shalt.err (!%p5334_p6)
}
  0x4f   :  { %s5338_s7 = scalar_lea.vmem %s29_s24, 512  ;;  %p5343_p8 = scmp.lt.s32.totalorder %s29_s24, %s29_s24 }
  0x50   :  { %p5339_p7 = scmp.ne.s32.totalorder %s29_s24, %s5338_s7  ;;  %p5344_p9 = scmp.lt.s32.totalorder %s5338_s7, %s5338_s7 }
  0x52   :  { %p5345_p10 = por %p5344_p9, %p5343_p8 }
  0x54   :  { %p5346_p11 = pnand %p5345_p10, %p5339_p7 }
  0x56   :  { %5349 = shalt.err (!%p5346_p11)
}
  0x57   :  { %34 = dma.hbm_to_vmem [thread:$0]  %s6101_s0, 512, %s29_s24, [#allocation3], %s5498_s25, %s5498_s25, %s5499_s26  }
  0x58   :  { %s5350_s1 = scalar_lea.hbm %s6103_s2, 64 }
  0x59   :  { %p5351_p12 = scmp.ne.s32.totalorder %s6103_s2, %s5350_s1  ;;  %p5354_p13 = scmp.lt.u32.totalorder %s5350_s1, %s6103_s2 }
  0x5b   :  { %p5356_p0 = pnand %p5354_p13, %p5351_p12 }
  0x5d   :  { %5359 = shalt.err (!%p5356_p0)
}
  0x5e   :  { %s5360_s20 = scalar_lea.vmem %s5642_s28, 64  ;;  %p5365_p2 = scmp.lt.s32.totalorder %s5642_s28, %s5642_s28 }
  0x5f   :  { %p5361_p1 = scmp.ne.s32.totalorder %s5642_s28, %s5360_s20  ;;  %p5366_p3 = scmp.lt.s32.totalorder %s5360_s20, %s5360_s20 }
  0x61   :  { %p5367_p4 = por %p5366_p3, %p5365_p2 }
  0x63   :  { %p5368_p5 = pnand %p5367_p4, %p5361_p1 }
  0x65   :  { %5371 = shalt.err (!%p5368_p5)
}
  0x66   :  { %s5504_s0 = smov 16   ;;  %s5505_s23 = smov 1  }
  0x67   :  { %58 = dma.hbm_to_vmem [thread:$0]  %s6103_s2, 64, %s5642_s28, [#allocation6], %s5504_s0, %s5504_s0, %s5505_s23  }
  0x68   :  { %s5506_s29 = smov [#allocation10]   ;;  %s5507_s11 = smov [#allocation13]  }
  0x69   :  { %s76_s30 = sshll.u32 %s5506_s29, 4  ;;  %s100_s3 = sshll.u32 %s5507_s11, 4  ;;  %s77_s30 = int_to_ptr.vmem [resolvable:$true] %s76_s30  ;;  %s5679_s3 = int_to_ptr.vmem [resolvable:$true] %s100_s3 }
  0x6a   :  { %s5372_s13 = scalar_lea.hbm %s6105_s4, 64 }
  0x6b   :  { %p5373_p6 = scmp.ne.s32.totalorder %s6105_s4, %s5372_s13  ;;  %p5376_p7 = scmp.lt.u32.totalorder %s5372_s13, %s6105_s4 }
  0x6d   :  { %p5378_p8 = pnand %p5376_p7, %p5373_p6 }
  0x6f   :  { %5381 = shalt.err (!%p5378_p8)
}
  0x70   :  { %s5382_s2 = scalar_lea.vmem %s77_s30, 64  ;;  %p5387_p10 = scmp.lt.s32.totalorder %s77_s30, %s77_s30 }
  0x71   :  { %p5383_p9 = scmp.ne.s32.totalorder %s77_s30, %s5382_s2  ;;  %p5388_p11 = scmp.lt.s32.totalorder %s5382_s2, %s5382_s2 }
  0x73   :  { %p5389_p12 = por %p5388_p11, %p5387_p10 }
  0x75   :  { %p5390_p13 = pnand %p5389_p12, %p5383_p9 }
  0x77   :  { %5393 = shalt.err (!%p5390_p13)
}
  0x78   :  { %82 = dma.hbm_to_vmem [thread:$0]  %s6105_s4, 64, %s77_s30, [#allocation9], %s5504_s0, %s5504_s0, %s5505_s23  }
  0x79   :  { %s5394_s19 = scalar_lea.hbm %s6107_s6, 64 }
  0x7a   :  { %p5395_p0 = scmp.ne.s32.totalorder %s6107_s6, %s5394_s19  ;;  %p5398_p1 = scmp.lt.u32.totalorder %s5394_s19, %s6107_s6 }
  0x7c   :  { %p5400_p2 = pnand %p5398_p1, %p5395_p0 }
  0x7e   :  { %5403 = shalt.err (!%p5400_p2)
}
  0x7f   :  { %s5404_s27 = scalar_lea.vmem %s5679_s3, 64  ;;  %p5409_p4 = scmp.lt.s32.totalorder %s5679_s3, %s5679_s3 }
  0x80   :  { %p5405_p3 = scmp.ne.s32.totalorder %s5679_s3, %s5404_s27  ;;  %p5410_p5 = scmp.lt.s32.totalorder %s5404_s27, %s5404_s27 }
  0x82   :  { %p5411_p6 = por %p5410_p5, %p5409_p4 }
  0x84   :  { %p5412_p7 = pnand %p5411_p6, %p5405_p3 }
  0x86   :  { %5415 = shalt.err (!%p5412_p7)
}
  0x87   :  { %106 = dma.hbm_to_vmem [thread:$0]  %s6107_s6, 64, %s5679_s3, [#allocation12], %s5504_s0, %s5504_s0, %s5505_s23  }
  0x88   :  { %s5508_s30 = smov [#allocation16]   ;;  %s5416_s13 = scalar_lea.hbm %s6109_s8, 16 }
  0x89   :  { %s125_s11 = sshll.u32 %s5508_s30, 4  ;;  %p5417_p8 = scmp.ne.s32.totalorder %s6109_s8, %s5416_s13  ;;  %s126_s11 = int_to_ptr.vmem [resolvable:$true] %s125_s11 }
  0x8a   :  { %p5420_p9 = scmp.lt.u32.totalorder %s5416_s13, %s6109_s8 }
  0x8c   :  { %p5422_p10 = pnand %p5420_p9, %p5417_p8 }
  0x8e   :  { %5425 = shalt.err (!%p5422_p10)
}
  0x8f   :  { %s5426_s2 = scalar_lea.vmem %s126_s11, 16  ;;  %s5430_s6 = scalar_lea.vmem %s126_s11, 32 }
  0x90   :  { %p5427_p11 = scmp.ne.s32.totalorder %s126_s11, %s5426_s2  ;;  %p5431_p12 = scmp.lt.s32.totalorder %s126_s11, %s126_s11 }
  0x91   :  { %p5432_p13 = scmp.lt.s32.totalorder %s5430_s6, %s5426_s2 }
  0x93   :  { %p5433_p0 = por %p5432_p13, %p5431_p12 }
  0x95   :  { %p5434_p1 = pnand %p5433_p0, %p5427_p11 }
  0x97   :  { %5437 = shalt.err (!%p5434_p1)
}
  0x98   :  { %128 = dma.hbm_to_vmem [thread:$0]  %s6109_s8, 16, %s126_s11, [#allocation15]  }
  0x99   :  { %5482 = dma.done.wait [#allocation3], 512  }
  0x9a   :  { %5483 = vsyncadd [#allocation3], 4294966784 }
  0x9b   :  { %5484 = dma.done.wait [#allocation6], 2112  }
  0x9c   :  { %5485 = vsyncadd [#allocation6], 4294965184 }
  0x9d   :  { %5486 = dma.done.wait [#allocation9], 2112  }
  0x9e   :  { %5487 = vsyncadd [#allocation9], 4294965184 }
  0x9f   :  { %5488 = dma.done.wait [#allocation12], 2112  }
  0xa0   :  { %5489 = vsyncadd [#allocation12], 4294965184 }
  0xa1   :  { %5490 = dma.done.wait [#allocation15], 528  }
  0xa2   :  { %5491 = vsyncadd [#allocation15], 4294966768  ;;  %v269_v0 = vld [vmem:[#allocation8] sm:$0xff]  ;;  %v270_v1 = vld [vmem:[#allocation8 + $0x8] sm:$0xff]  ;;  %vm171_vm0 = vcmask 261120   ;;  %v5509_v22 = vmov 0.0  }
  0xa3   :  { %v160_v2 = vld [vmem:[#allocation5] sm:$0xff]  ;;  %v5051_v3 = vpack.c.bf16 %v270_v1, %v269_v0  ;;  %v161_v4 = vld [vmem:[#allocation5 + $0x8] sm:$0xff]  ;;  %v271_v5 = vld [vmem:[#allocation8 + $0x10] sm:$0xff]  ;;  %vm5510_vm1 = vmmov 0   ;;  %vm461_vm2 = vcmask 64512   ;;  %s5511_s8 = smov [#allocation18]  }
  0xa4   :  { %v272_v6 = vld [vmem:[#allocation8 + $0x18] sm:$0xff]  ;;  %v5043_v7 = vpack.c.bf16 %v161_v4, %v160_v2  ;;  %v162_v9 = vld [vmem:[#allocation5 + $0x10] sm:$0xff]  ;;  %v365_v13 = vld [vmem:[#allocation11] sm:$0xff]  ;;  %s4358_s3 = sshll.u32 %s5511_s8, 4  ;;  %s4359_s3 = int_to_ptr.vmem [resolvable:$true] %s4358_s3 }
  0xa5   :  { %v5055_v8 = vpack.c.bf16 %v272_v6, %v271_v5  ;;  %v163_v10 = vld [vmem:[#allocation5 + $0x18] sm:$0xff]  ;;  %v5728_v11 = vld [vmem:[#allocation2] sm:$0xff]  ;;  %5052 = vmatprep.subr.bf16.mxu1 %v5051_v3  ;;  %v366_v14 = vld [vmem:[#allocation11 + $0x8] sm:$0xff]  ;;  %s5438_s28 = scalar_lea.vmem %s4359_s3, 2048  ;;  %p5443_p3 = scmp.lt.s32.totalorder %s4359_s3, %s4359_s3 }
  0xa6   :  { %v5047_v12 = vpack.c.bf16 %v163_v10, %v162_v9  ;;  %4705 = vmatprep.mubr.msk.f32.mxu1 %vm171_vm0, %v5728_v11  ;;  %5054 = vmatpush3.bf16.msra.mxu1 %v5051_v3  ;;  %v5059_v15 = vpack.c.bf16 %v366_v14, %v365_v13  ;;  %v367_v16 = vld [vmem:[#allocation11 + $0x10] sm:$0xff]  ;;  %v368_v17 = vld [vmem:[#allocation11 + $0x18] sm:$0xff]  ;;  %v5734_v18 = vld [vmem:[#allocation2 + $0x8] sm:$0xff]  ;;  %p5439_p2 = scmp.ne.s32.totalorder %s4359_s3, %s5438_s28  ;;  %p5444_p4 = scmp.lt.s32.totalorder %s5438_s28, %s5438_s28 }
  0xa7   :  { %5044 = vmatprep.subr.bf16.mxu0 %v5043_v7  ;;  %5056 = vmatprep.subr.bf16.mxu1 %v5055_v8  ;;  %v5736_v19 = vld [vmem:[#allocation2 + $0x10] sm:$0xff]  ;;  %v5063_v20 = vpack.c.bf16 %v368_v17, %v367_v16  ;;  %v5744_v21 = vld [vmem:[#allocation2 + $0x18] sm:$0xff]  ;;  %v4383_v23 = vld [vmem:[#allocation10] ss:$0 sm:$0xff] }
  0xa8   :  { %5046 = vmatpush3.bf16.msra.mxu0 %v5043_v7  ;;  %4691 = vmatprep.mubr.msk.f32.mxu0 %vm171_vm0, %v5728_v11  ;;  %v4378_v25 = vld [vmem:[#allocation7] ss:$0 sm:$0xff]  ;;  %v5790_v43 = vld [vmem:[#allocation13] ss:$0 sm:$0xff]  ;;  %p5445_p5 = por %p5444_p4, %p5443_p3 }
  0xa9   :  { %5048 = vmatprep.subr.bf16.mxu0 %v5047_v12 }
  0xaa   :  { %5058 = vmatpush3.bf16.msra.mxu1 %v5055_v8  ;;  %p5446_p6 = pnand %p5445_p5, %p5439_p2 }
  0xab   :  { %5139 = vmatprep.subr.bf16.mxu1 %v5059_v15 }
  0xac   :  { %5050 = vmatpush3.bf16.msra.mxu0 %v5047_v12 }
  0xad   :  { %5060 = vmatprep.subr.bf16.mxu0 %v5059_v15  ;;  %4706 = vmatmul.mubr.msk.f32.vlgmr.msra.gmra.mrb[0].mxu1 %vm171_vm0, %v5734_v18 }
  0xae   :  { %4708 = vmatprep.mubr.msk.f32.mxu1 %vm171_vm0, %v5736_v19  ;;  %5141 = vmatpush3.bf16.msra.mxu1 %v5059_v15 }
  0xaf   :  { %4692 = vmatmul.mubr.msk.f32.vlgmr.msra.gmra.mrb[0].mxu0 %vm171_vm0, %v5734_v18  ;;  %5140 = vmatprep.subr.bf16.mxu1 %v5063_v20 }
  0xb0   :  { %4694 = vmatprep.mubr.msk.f32.mxu0 %vm171_vm0, %v5736_v19  ;;  %5062 = vmatpush3.bf16.msra.mxu0 %v5059_v15 }
  0xb1   :  { %4709 = vmatmul.mubr.msk.f32.gmra.mrb[2].mxu1 %vm171_vm0, %v5744_v21  ;;  %5064 = vmatprep.subr.bf16.mxu0 %v5063_v20 }
  0xb2   :  { %4722 = vmatprep.mubr.msk.f32.mxu1 %vm171_vm0, %v5736_v19  ;;  %5142 = vmatpush3.bf16.msra.mxu1 %v5063_v20 }
  0xb3   :  { %4695 = vmatmul.mubr.msk.f32.gmra.mrb[2].mxu0 %vm171_vm0, %v5744_v21  ;;  %4725 = vmatprep.subr.mxu1 %v5509_v22 }
  0xb4   :  { %4719 = vmatprep.mubr.msk.f32.mxu0 %vm171_vm0, %v5728_v11  ;;  %5066 = vmatpush3.bf16.msra.mxu0 %v5063_v20 }
  0xb5   :  { %4723 = vmatmul.mubr.msk.f32.vlgmr.msra.gmra.mrb[4].mxu1 %vm171_vm0, %v5744_v21  ;;  %4735 = vmatprep.subr.mxu0 %v5509_v22 }
  0xb6   :  { %4727 = vmatprep.mubr.msk.f32.mxu1 %vm5510_vm1, %v5509_v22 }
  0xb7   :  { %4720 = vmatmul.mubr.msk.f32.vlgmr.msra.gmra.mrb[4].mxu0 %vm171_vm0, %v5734_v18 }
  0xb8   :  { %4737 = vmatprep.mubr.msk.f32.mxu0 %vm5510_vm1, %v5509_v22 }
 0x180   :  { %v4707_v24 = vpop.f32.mrb[0].mxu1 }
 0x181   :  { %v346_v26 = vpop.f32.mrb[1].mxu1  ;;  %v352_v34 = vadd.f32 %v4707_v24, %v4383_v23 }
 0x182   :  { %v4693_v27 = vpop.f32.mrb[0].mxu0  ;;  %v347_v28 = vadd.f32 %v4383_v23, %v346_v26  ;;  %v1207_v26 = vld [vmem:[#allocation8 + $0x28] sm:$0xff] }
 0x183   :  { %v250_v29 = vpop.f32.mrb[1].mxu0  ;;  %v256_v39 = vadd.f32 %v4693_v27, %v4378_v25 }
 0x184   :  { %v251_v30 = vadd.f32 %v4378_v25, %v250_v29  ;;  %4726 = vmatpush3.xpose.msk.msra.mxu1 %vm461_vm2, %v347_v28  ;;  %v4710_v31 = vpop.f32.mrb[2].mxu1 }
 0x185   :  { %4730 = vmatprep.subr.mxu1 %v5509_v22  ;;  %v356_v32 = vpop.f32.mrb[3].mxu1  ;;  %v362_v37 = vadd.f32 %v4710_v31, %v4383_v23  ;;  %v1108_v31 = vld [vmem:[#allocation5 + $0x20] sm:$0xff] }
 0x186   :  { %v4696_v33 = vpop.f32.mrb[2].mxu0  ;;  %v357_v35 = vadd.f32 %v4383_v23, %v356_v32  ;;  %v1109_v32 = vld [vmem:[#allocation5 + $0x28] sm:$0xff] }
 0x187   :  { %v260_v36 = vpop.f32.mrb[3].mxu0  ;;  %4728 = vmatmul.mubr.msk.f32.vlgmr.msra.gmra.mrb[6].mxu1 %vm461_vm2, %v251_v30  ;;  %v266_v42 = vadd.f32 %v4696_v33, %v4378_v25  ;;  %v1208_v33 = vld [vmem:[#allocation8 + $0x30] sm:$0xff] }
 0x188   :  { %4731 = vmatpush3.xpose.msk.msra.mxu1 %vm461_vm2, %v352_v34  ;;  %4732 = vmatprep.mubr.msk.f32.mxu1 %vm5510_vm1, %v5509_v22  ;;  %v261_v38 = vadd.f32 %v4378_v25, %v260_v36  ;;  %v5774_v40 = vpop.f32.mrb[4].mxu1  ;;  %v1206_v25 = vld [vmem:[#allocation8 + $0x20] sm:$0xff]  ;;  %v1209_v34 = vld [vmem:[#allocation8 + $0x38] sm:$0xff] }
 0x189   :  { %4736 = vmatpush3.xpose.msk.msra.mxu0 %vm461_vm2, %v357_v35  ;;  %4740 = vmatprep.subr.mxu1 %v5509_v22  ;;  %v5776_v41 = vpop.f32.mrb[5].mxu1  ;;  %v5075_v29 = vpack.c.bf16 %v1207_v26, %v1206_v25  ;;  %v458_v30 = vadd.f32 %v5774_v40, %v5790_v43  ;;  %v5067_v40 = vpack.c.bf16 %v1109_v32, %v1108_v31 }
 0x18a   :  { %4745 = vmatprep.subr.mxu0 %v5509_v22  ;;  %v4721_v44 = vpop.f32.mrb[4].mxu0 }
 0x18b   :  { %4733 = vmatmul.mubr.msk.f32.vlgmr.msra.gmra.mrb[8].mxu1 %vm461_vm2, %v256_v39  ;;  %v448_v45 = vadd.f32 %v4721_v44, %v5790_v43  ;;  %v442_v46 = vpop.f32.mrb[5].mxu0  ;;  %v1110_v44 = vld [vmem:[#allocation5 + $0x30] sm:$0xff] }
 0x18c   :  { %4741 = vmatpush3.xpose.msk.msra.mxu1 %vm461_vm2, %v362_v37  ;;  %4738 = vmatmul.mubr.msk.f32.vlgmr.msra.gmra.mrb[6].mxu0 %vm461_vm2, %v261_v38  ;;  %v443_v47 = vadd.f32 %v5790_v43, %v442_v46  ;;  %v453_v38 = vadd.f32 %v5790_v43, %v5776_v41  ;;  %v1304_v43 = vld [vmem:[#allocation11 + $0x20] sm:$0xff] }
 0x18d   :  { %4742 = vmatprep.mubr.msk.f32.mxu1 %vm5510_vm1, %v5509_v22  ;;  %4750 = vmatprep.subr.mxu1 %v5509_v22 }
 0x18e   :  { %4747 = vmatprep.mubr.msk.f32.mxu0 %vm5510_vm1, %v5509_v22  ;;  %4746 = vmatpush3.msra.mxu0 %v443_v47 }
 0x18f   :  { %4743 = vmatmul.mubr.msk.f32.vlgmr.msra.gmra.mrb[10].mxu1 %vm461_vm2, %v266_v42  ;;  %4755 = vmatprep.subr.mxu0 %v5509_v22  ;;  %v5079_v42 = vpack.c.bf16 %v1209_v34, %v1208_v33 }
 0x190   :  { %4752 = vmatprep.mubr.msk.f32.mxu1 %vm5510_vm1, %v5509_v22  ;;  %4751 = vmatpush3.msra.mxu1 %v448_v45  ;;  %v1111_v45 = vld [vmem:[#allocation5 + $0x38] sm:$0xff] }
 0x191   :  { %4760 = vmatprep.subr.mxu1 %v5509_v22  ;;  %v5071_v41 = vpack.c.bf16 %v1111_v45, %v1110_v44 }
 0x25a   :  { %v534_v48 = vpop.f32.mrb[6].mxu1 }
 0x25b   :  { %v4729_v49 = vpop.f32.mrb[7].mxu1  ;;  %v766_v57 = vsel %vm461_vm2, %v534_v48, -inf }
 0x25e   :  { %v610_v50 = vpop.f32.mrb[8].mxu1 }
 0x25f   :  { %v4734_v51 = vpop.f32.mrb[9].mxu1  ;;  %v769_v52 = vsel %vm461_vm2, %v610_v50, -inf  ;;  %v686_v53 = vpop.f32.mrb[6].mxu0 }
 0x260   :  { %770 = vmax.xlane.f32.xlu0 %v769_v52  ;;  %v4739_v54 = vpop.f32.mrb[7].mxu0  ;;  %v772_v59 = vsel %vm461_vm2, %v686_v53, -inf  ;;  %v1307_v51 = vld [vmem:[#allocation11 + $0x38] sm:$0xff] }
 0x262   :  { %v762_v55 = vpop.f32.mrb[10].mxu1 }
 0x263   :  { %v4744_v56 = vpop.f32.mrb[11].mxu1  ;;  %v775_v58 = vsel %vm461_vm2, %v762_v55, -inf }
 0x264   :  { %767 = vmax.xlane.f32.xlu0 %v766_v57  ;;  %776 = vmax.xlane.f32.xlu1 %v775_v58 }
 0x268   :  { %773 = vmax.xlane.f32.xlu1 %v772_v59 }
 0x2ed   :  { %v771_v60 = vpop.xlane.xlu0 %770 }
 0x2ee   :  { %v779_v61 = vsub.f32 %v610_v50, %v771_v60  ;;  %v1306_v50 = vld [vmem:[#allocation11 + $0x30] sm:$0xff] }
 0x2ef   :  { %v5087_v52 = vpack.c.bf16 %v1307_v51, %v1306_v50 }
 0x2f0   :  { %v784_v62 = vmul.f32 1.442695, %v779_v61  ;;  %v4410_v61 = vld [vmem:[#allocation10 + $0x1] ss:$0 sm:$0xff] }
 0x2f1   :  { %v768_v63 = vpop.xlane.xlu0 %767  ;;  %v777_v0 = vpop.xlane.xlu1 %776 }
 0x2f2   :  { %5172 = vpow2.f32 %v784_v62  ;;  %v778_v1 = vsub.f32 %v534_v48, %v768_v63  ;;  %v781_v2 = vsub.f32 %v762_v55, %v777_v0  ;;  %v1305_v48 = vld [vmem:[#allocation11 + $0x28] sm:$0xff] }
 0x2f3   :  { %v5083_v49 = vpack.c.bf16 %v1305_v48, %v1304_v43 }
 0x2f4   :  { %v782_v3 = vmul.f32 1.442695, %v778_v1  ;;  %v788_v4 = vmul.f32 1.442695, %v781_v2  ;;  %v4405_v1 = vld [vmem:[#allocation7 + $0x1] ss:$0 sm:$0xff] }
 0x2f5   :  { %v774_v5 = vpop.xlane.xlu1 %773 }
 0x2f6   :  { %5174 = vpow2.f32 %v782_v3  ;;  %v780_v6 = vsub.f32 %v686_v53, %v774_v5 }
 0x2f7   :  { %5176 = vpow2.f32 %v788_v4 }
 0x2f8   :  { %v786_v7 = vmul.f32 1.442695, %v780_v6 }
 0x2fa   :  { %5178 = vpow2.f32 %v786_v7 }
 0x2fc   :  { %v5173_v8 = vpop.eup %5172 }
 0x2fd   :  { %v793_v9 = vsel %vm461_vm2, %v5173_v8, 0.0 }
 0x2fe   :  { %794 = vadd.xlane.f32.xlu0 %v793_v9 }
 0x300   :  { %v5175_v10 = vpop.eup %5174 }
 0x301   :  { %v5177_v12 = vpop.eup %5176  ;;  %v790_v13 = vsel %vm461_vm2, %v5175_v10, 0.0 }
 0x302   :  { %791 = vadd.xlane.f32.xlu1 %v790_v13  ;;  %v799_v14 = vsel %vm461_vm2, %v5177_v12, 0.0 }
 0x303   :  { %800 = vadd.xlane.f32.xlu0 %v799_v14 }
 0x304   :  { %v5179_v15 = vpop.eup %5178 }
 0x305   :  { %v796_v16 = vsel %vm461_vm2, %v5179_v15, 0.0 }
 0x306   :  { %797 = vadd.xlane.f32.xlu1 %v796_v16  ;;  %v4415_v16 = vld [vmem:[#allocation13 + $0x1] ss:$0 sm:$0xff] }
 0x38b   :  { %v795_v17 = vpop.xlane.xlu0 %794 }
 0x38c   :  { %5180 = vrcp.f32 %v795_v17 }
 0x38f   :  { %v792_v20 = vpop.xlane.xlu1 %791 }
 0x390   :  { %v801_v23 = vpop.xlane.xlu0 %800  ;;  %5182 = vrcp.f32 %v792_v20 }
 0x391   :  { %5184 = vrcp.f32 %v801_v23 }
 0x393   :  { %v798_v24 = vpop.xlane.xlu1 %797 }
 0x394   :  { %5186 = vrcp.f32 %v798_v24 }
 0x396   :  { %v5181_v27 = vpop.eup %5180 }
 0x397   :  { %v807_v28 = vmul.f32 %v5181_v27, %v5173_v8 }
 0x399   :  { %811 = vst.msk [vmem:[#allocation18 + $0x20] sm:$0xff] %vm461_vm2, %v807_v28  ;;  %4753 = vmatmul.mubr.msk.f32.vlgmr.msra.gmra.mrb[12].mxu1 %vm461_vm2, %v807_v28 }
 0x39a   :  { %v5183_v35 = vpop.eup %5182  ;;  %4761 = vmatpush3.msra.mxu1 %v458_v30  ;;  %4762 = vmatprep.mubr.msk.f32.mxu1 %vm5510_vm1, %v5509_v22 }
 0x39b   :  { %v5185_v36 = vpop.eup %5184  ;;  %v806_v37 = vmul.f32 %v5183_v35, %v5175_v10  ;;  %5076 = vmatprep.subr.bf16.mxu1 %v5075_v29 }
 0x39c   :  { %v809_v39 = vmul.f32 %v5185_v36, %v5177_v12 }
 0x39d   :  { %810 = vst.msk [vmem:[#allocation18] sm:$0xff] %vm461_vm2, %v806_v37  ;;  %4748 = vmatmul.mubr.msk.f32.vlgmr.msra.gmra.mrb[8].mxu0 %vm461_vm2, %v806_v37 }
 0x39e   :  { %v5187_v46 = vpop.eup %5186  ;;  %813 = vst.msk [vmem:[#allocation18 + $0x60] sm:$0xff] %vm461_vm2, %v809_v39  ;;  %4756 = vmatpush3.msra.mxu0 %v453_v38  ;;  %4763 = vmatmul.mubr.msk.f32.vlgmr.msra.gmra.mrb[14].mxu1 %vm461_vm2, %v809_v39 }
 0x39f   :  { %v808_v47 = vmul.f32 %v5187_v46, %v5179_v15  ;;  %5078 = vmatpush3.bf16.msra.mxu1 %v5075_v29  ;;  %4757 = vmatprep.mubr.msk.f32.mxu0 %vm5510_vm1, %v5509_v22 }
 0x3a0   :  { %5068 = vmatprep.subr.bf16.mxu0 %v5067_v40  ;;  %5080 = vmatprep.subr.bf16.mxu1 %v5079_v42 }
 0x3a1   :  { %812 = vst.msk [vmem:[#allocation18 + $0x40] sm:$0xff] %vm461_vm2, %v808_v47  ;;  %4758 = vmatmul.mubr.msk.f32.vlgmr.msra.gmra.mrb[10].mxu0 %vm461_vm2, %v808_v47  ;;  %4787 = vmatprep.mubr.msk.f32.mxu1 %vm171_vm0, %v5728_v11 }
 0x3a2   :  { %5070 = vmatpush3.bf16.msra.mxu0 %v5067_v40  ;;  %4773 = vmatprep.mubr.msk.f32.mxu0 %vm171_vm0, %v5728_v11 }
 0x3a3   :  { %5082 = vmatpush3.bf16.msra.mxu1 %v5079_v42  ;;  %5072 = vmatprep.subr.bf16.mxu0 %v5071_v41 }
 0x3a4   :  { %4807 = vmatprep.subr.mxu1 %v5509_v22 }
 0x3a6   :  { %4788 = vmatmul.mubr.msk.f32.vlgmr.msra.gmra.mrb[16].mxu1 %vm171_vm0, %v5734_v18  ;;  %5074 = vmatpush3.bf16.msra.mxu0 %v5071_v41 }
 0x3a7   :  { %4790 = vmatprep.mubr.msk.f32.mxu1 %vm171_vm0, %v5736_v19  ;;  %5084 = vmatprep.subr.bf16.mxu0 %v5083_v49 }
 0x3a9   :  { %4774 = vmatmul.mubr.msk.f32.vlgmr.msra.gmra.mrb[12].mxu0 %vm171_vm0, %v5734_v18 }
 0x3aa   :  { %4791 = vmatmul.mubr.msk.f32.gmra.mrb[18].mxu1 %vm171_vm0, %v5744_v21  ;;  %4776 = vmatprep.mubr.msk.f32.mxu0 %vm171_vm0, %v5736_v19 }
 0x3ab   :  { %4809 = vmatprep.mubr.msk.f32.mxu1 %vm5510_vm1, %v5509_v22  ;;  %5086 = vmatpush3.bf16.msra.mxu0 %v5083_v49 }
 0x3ac   :  { %5088 = vmatprep.subr.bf16.mxu0 %v5087_v52 }
 0x3ad   :  { %4777 = vmatmul.mubr.msk.f32.gmra.mrb[14].mxu0 %vm171_vm0, %v5744_v21 }
 0x3ae   :  { %4801 = vmatprep.mubr.msk.f32.mxu0 %vm171_vm0, %v5728_v11 }
 0x3af   :  { %5090 = vmatpush3.bf16.msra.mxu0 %v5087_v52 }
 0x3b0   :  { %4817 = vmatprep.subr.mxu0 %v5509_v22 }
 0x3b2   :  { %4802 = vmatmul.mubr.msk.f32.vlgmr.msra.gmra.mrb[16].mxu0 %vm171_vm0, %v5734_v18 }
 0x3b3   :  { %4804 = vmatprep.mubr.msk.f32.mxu0 %vm171_vm0, %v5736_v19 }
 0x3b6   :  { %4805 = vmatmul.mubr.msk.f32.gmra.mrb[18].mxu0 %vm171_vm0, %v5744_v21 }
 0x3b7   :  { %4819 = vmatprep.mubr.msk.f32.mxu0 %vm5510_vm1, %v5509_v22 }
 0x46c   :  { %v5850_v53 = vpop.f32.mrb[12].mxu1 }
 0x46d   :  { %v4754_v54 = vpop.f32.mrb[13].mxu1 }
 0x470   :  { %v5852_v55 = vpop.f32.mrb[8].mxu0 }
 0x471   :  { %v5854_v56 = vpop.f32.mrb[14].mxu1  ;;  %v4749_v57 = vpop.f32.mrb[9].mxu0 }
 0x472   :  { %v4764_v58 = vpop.f32.mrb[15].mxu1 }
 0x474   :  { %v5856_v59 = vpop.f32.mrb[10].mxu0 }
 0x475   :  { %v4759_v60 = vpop.f32.mrb[11].mxu0 }
 0x479   :  { %v4789_v62 = vpop.f32.mrb[16].mxu1 }
 0x47a   :  { %v1284_v63 = vpop.f32.mrb[17].mxu1  ;;  %v1290_v7 = vadd.f32 %v4789_v62, %v4410_v61 }
 0x47b   :  { %v1285_v0 = vadd.f32 %v4410_v61, %v1284_v63 }
 0x47c   :  { %v4775_v2 = vpop.f32.mrb[12].mxu0 }
 0x47d   :  { %4808 = vmatpush3.xpose.msk.msra.mxu1 %vm461_vm2, %v1285_v0  ;;  %v1186_v3 = vpop.f32.mrb[13].mxu0  ;;  %v4792_v4 = vpop.f32.mrb[18].mxu1  ;;  %v1192_v13 = vadd.f32 %v4775_v2, %v4405_v1 }
 0x47e   :  { %v1187_v5 = vadd.f32 %v4405_v1, %v1186_v3  ;;  %v1294_v6 = vpop.f32.mrb[19].mxu1  ;;  %4812 = vmatprep.subr.mxu1 %v5509_v22  ;;  %v1300_v10 = vadd.f32 %v4792_v4, %v4410_v61 }
 0x47f   :  { %v1295_v8 = vadd.f32 %v4410_v61, %v1294_v6 }
 0x480   :  { %v4778_v9 = vpop.f32.mrb[14].mxu0  ;;  %4810 = vmatmul.mubr.msk.f32.vlgmr.msra.gmra.mrb[20].mxu1 %vm461_vm2, %v1187_v5 }
 0x481   :  { %4813 = vmatpush3.xpose.msk.msra.mxu1 %vm461_vm2, %v1290_v7  ;;  %v1196_v12 = vpop.f32.mrb[15].mxu0  ;;  %4818 = vmatpush3.xpose.msk.msra.mxu0 %vm461_vm2, %v1295_v8  ;;  %v1202_v15 = vadd.f32 %v4778_v9, %v4405_v1  ;;  %v2243_v7 = vld [vmem:[#allocation5 + $0x40] sm:$0xff]  ;;  %v2244_v8 = vld [vmem:[#allocation5 + $0x48] sm:$0xff] }
 0x482   :  { %v1197_v14 = vadd.f32 %v4405_v1, %v1196_v12  ;;  %4814 = vmatprep.mubr.msk.f32.mxu1 %vm5510_vm1, %v5509_v22  ;;  %4822 = vmatprep.subr.mxu1 %v5509_v22 }
 0x483   :  { %4827 = vmatprep.subr.mxu0 %v5509_v22 }
 0x484   :  { %4815 = vmatmul.mubr.msk.f32.vlgmr.msra.gmra.mrb[22].mxu1 %vm461_vm2, %v1192_v13  ;;  %4820 = vmatmul.mubr.msk.f32.vlgmr.msra.gmra.mrb[20].mxu0 %vm461_vm2, %v1197_v14  ;;  %v5091_v14 = vpack.c.bf16 %v2244_v8, %v2243_v7 }
 0x485   :  { %4823 = vmatpush3.xpose.msk.msra.mxu1 %vm461_vm2, %v1300_v10  ;;  %4824 = vmatprep.mubr.msk.f32.mxu1 %vm5510_vm1, %v5509_v22  ;;  %v4803_v17 = vpop.f32.mrb[16].mxu0 }
 0x486   :  { %4832 = vmatprep.subr.mxu1 %v5509_v22  ;;  %4829 = vmatprep.mubr.msk.f32.mxu0 %vm5510_vm1, %v5509_v22  ;;  %v1388_v20 = vadd.f32 %v4803_v17, %v4415_v16  ;;  %v1382_v23 = vpop.f32.mrb[17].mxu0 }
 0x487   :  { %v1383_v24 = vadd.f32 %v4415_v16, %v1382_v23 }
 0x488   :  { %4825 = vmatmul.mubr.msk.f32.vlgmr.msra.gmra.mrb[24].mxu1 %vm461_vm2, %v1202_v15  ;;  %v2245_v15 = vld [vmem:[#allocation5 + $0x50] sm:$0xff] }
 0x489   :  { %4834 = vmatprep.mubr.msk.f32.mxu1 %vm5510_vm1, %v5509_v22  ;;  %4833 = vmatpush3.msra.mxu1 %v1388_v20  ;;  %v4806_v25 = vpop.f32.mrb[18].mxu0 }
 0x48a   :  { %4842 = vmatprep.subr.mxu1 %v5509_v22  ;;  %v5879_v26 = vadd.f32 %v4806_v25, %v4415_v16  ;;  %v1392_v27 = vpop.f32.mrb[19].mxu0  ;;  %4828 = vmatpush3.msra.mxu0 %v1383_v24  ;;  %v2341_v24 = vld [vmem:[#allocation8 + $0x40] sm:$0xff]  ;;  %v2342_v25 = vld [vmem:[#allocation8 + $0x48] sm:$0xff] }
 0x48b   :  { %v1393_v28 = vadd.f32 %v4415_v16, %v1392_v27  ;;  %4837 = vmatprep.subr.mxu0 %v5509_v22  ;;  %v2246_v16 = vld [vmem:[#allocation5 + $0x58] sm:$0xff]  ;;  %v5099_v27 = vpack.c.bf16 %v2342_v25, %v2341_v24 }
 0x48c   :  { %v5095_v23 = vpack.c.bf16 %v2246_v16, %v2245_v15 }
 0x553   :  { %v1473_v29 = vpop.f32.mrb[20].mxu1 }
 0x554   :  { %v4811_v30 = vpop.f32.mrb[21].mxu1  ;;  %v1705_v31 = vsel %vm461_vm2, %v1473_v29, -inf }
 0x555   :  { %1706 = vmax.xlane.f32.xlu1 %v1705_v31  ;;  %v2047_v30 = vld [vmem:[#allocation14 + $0x8] sm:$0xff]  ;;  %v1106_v31 = vld [vmem:[#allocation14] sm:$0xff] }
 0x557   :  { %v1549_v32 = vpop.f32.mrb[22].mxu1  ;;  %v1625_v33 = vpop.f32.mrb[20].mxu0 }
 0x558   :  { %v4816_v34 = vpop.f32.mrb[23].mxu1  ;;  %v1711_v35 = vsel %vm461_vm2, %v1625_v33, -inf  ;;  %v1708_v36 = vsel %vm461_vm2, %v1549_v32, -inf  ;;  %v4821_v37 = vpop.f32.mrb[21].mxu0 }
 0x559   :  { %1712 = vmax.xlane.f32.xlu1 %v1711_v35  ;;  %1709 = vmax.xlane.f32.xlu0 %v1708_v36  ;;  %v2439_v34 = vld [vmem:[#allocation11 + $0x40] sm:$0xff]  ;;  %v2440_v35 = vld [vmem:[#allocation11 + $0x48] sm:$0xff] }
 0x55a   :  { %v5107_v37 = vpack.c.bf16 %v2440_v35, %v2439_v34 }
 0x55b   :  { %v1701_v38 = vpop.f32.mrb[24].mxu1 }
 0x55c   :  { %v4826_v39 = vpop.f32.mrb[25].mxu1  ;;  %v1714_v40 = vsel %vm461_vm2, %v1701_v38, -inf }
 0x55d   :  { %1715 = vmax.xlane.f32.xlu0 %v1714_v40 }
 0x5e2   :  { %v1707_v42 = vpop.xlane.xlu1 %1706 }
 0x5e3   :  { %v1717_v44 = vsub.f32 %v1473_v29, %v1707_v42 }
 0x5e5   :  { %v1721_v45 = vmul.f32 1.442695, %v1717_v44  ;;  %v2441_v44 = vld [vmem:[#allocation11 + $0x50] sm:$0xff] }
 0x5e6   :  { %v1713_v46 = vpop.xlane.xlu1 %1712  ;;  %v1710_v47 = vpop.xlane.xlu0 %1709 }
 0x5e7   :  { %5188 = vpow2.f32 %v1721_v45  ;;  %v1719_v41 = vsub.f32 %v1625_v33, %v1713_v46  ;;  %v1718_v43 = vsub.f32 %v1549_v32, %v1710_v47  ;;  %v2442_v45 = vld [vmem:[#allocation11 + $0x58] sm:$0xff] }
 0x5e8   :  { %v5111_v47 = vpack.c.bf16 %v2442_v45, %v2441_v44 }
 0x5e9   :  { %v1725_v48 = vmul.f32 1.442695, %v1719_v41  ;;  %v1723_v49 = vmul.f32 1.442695, %v1718_v43 }
 0x5ea   :  { %v1716_v50 = vpop.xlane.xlu0 %1715 }
 0x5eb   :  { %5190 = vpow2.f32 %v1725_v48  ;;  %v1720_v51 = vsub.f32 %v1701_v38, %v1716_v50 }
 0x5ec   :  { %5192 = vpow2.f32 %v1723_v49  ;;  %v4440_v49 = vld [vmem:[#allocation7 + $0x2] ss:$0 sm:$0xff] }
 0x5ed   :  { %v1727_v52 = vmul.f32 1.442695, %v1720_v51 }
 0x5ef   :  { %5194 = vpow2.f32 %v1727_v52 }
 0x5f1   :  { %v5189_v54 = vpop.eup %5188 }
 0x5f2   :  { %v1729_v57 = vsel %vm461_vm2, %v5189_v54, 0.0 }
 0x5f3   :  { %1730 = vadd.xlane.f32.xlu1 %v1729_v57 }
 0x5f5   :  { %v5191_v58 = vpop.eup %5190 }
 0x5f6   :  { %v5193_v60 = vpop.eup %5192  ;;  %v1735_v61 = vsel %vm461_vm2, %v5191_v58, 0.0 }
 0x5f7   :  { %1736 = vadd.xlane.f32.xlu1 %v1735_v61  ;;  %v1732_v62 = vsel %vm461_vm2, %v5193_v60, 0.0 }
 0x5f8   :  { %1733 = vadd.xlane.f32.xlu0 %v1732_v62 }
 0x5f9   :  { %v5195_v63 = vpop.eup %5194 }
 0x5fa   :  { %v1738_v0 = vsel %vm461_vm2, %v5195_v63, 0.0 }
 0x5fc   :  { %1739 = vadd.xlane.f32.xlu0 %v1738_v0 }
 0x680   :  { %v1731_v1 = vpop.xlane.xlu1 %1730 }
 0x681   :  { %5196 = vrcp.f32 %v1731_v1 }
 0x684   :  { %v1737_v2 = vpop.xlane.xlu1 %1736 }
 0x685   :  { %5198 = vrcp.f32 %v1737_v2  ;;  %v1734_v3 = vpop.xlane.xlu0 %1733 }
 0x686   :  { %5200 = vrcp.f32 %v1734_v3 }
 0x689   :  { %v1740_v4 = vpop.xlane.xlu0 %1739 }
 0x68a   :  { %5202 = vrcp.f32 %v1740_v4 }
 0x68b   :  { %v5197_v5 = vpop.eup %5196 }
 0x68c   :  { %v1745_v6 = vmul.f32 %v5197_v5, %v5189_v54 }
 0x68e   :  { %1750 = vst.msk [vmem:[#allocation18 + $0x8] sm:$0xff] %vm461_vm2, %v1745_v6  ;;  %4830 = vmatmul.mubr.msk.f32.vlgmr.msra.gmra.mrb[22].mxu0 %vm461_vm2, %v1745_v6 }
 0x68f   :  { %v5199_v9 = vpop.eup %5198  ;;  %4838 = vmatpush3.msra.mxu0 %v1393_v28  ;;  %4839 = vmatprep.mubr.msk.f32.mxu0 %vm5510_vm1, %v5509_v22  ;;  %v2343_v28 = vld [vmem:[#allocation8 + $0x50] sm:$0xff] }
 0x690   :  { %v5201_v10 = vpop.eup %5200  ;;  %v1747_v12 = vmul.f32 %v5199_v9, %v5191_v58  ;;  %4847 = vmatprep.subr.mxu0 %v2047_v30 }
 0x691   :  { %v1746_v13 = vmul.f32 %v5201_v10, %v5193_v60  ;;  %v4450_v60 = vld [vmem:[#allocation13 + $0x2] ss:$0 sm:$0xff] }
 0x692   :  { %1752 = vst.msk [vmem:[#allocation18 + $0x48] sm:$0xff] %vm461_vm2, %v1747_v12  ;;  %4840 = vmatmul.mubr.msk.f32.vlgmr.msra.gmra.mrb[24].mxu0 %vm461_vm2, %v1747_v12 }
 0x693   :  { %1751 = vst.msk [vmem:[#allocation18 + $0x28] sm:$0xff] %vm461_vm2, %v1746_v13  ;;  %4835 = vmatmul.mubr.msk.f32.vlgmr.msra.gmra.mrb[26].mxu1 %vm461_vm2, %v1746_v13  ;;  %4848 = vmatpush3.msra.mxu0 %v2047_v30 }
 0x694   :  { %v5203_v17 = vpop.eup %5202  ;;  %4843 = vmatpush3.msra.mxu1 %v5879_v26  ;;  %4844 = vmatprep.mubr.msk.f32.mxu1 %vm5510_vm1, %v5509_v22  ;;  %v2344_v26 = vld [vmem:[#allocation8 + $0x58] sm:$0xff] }
 0x695   :  { %v1748_v20 = vmul.f32 %v5203_v17, %v5195_v63  ;;  %5092 = vmatprep.subr.bf16.mxu1 %v5091_v14  ;;  %v5103_v29 = vpack.c.bf16 %v2344_v26, %v2343_v28  ;;  %4855 = vmatprep.subr.mxu0 %v1106_v31 }
 0x697   :  { %1753 = vst.msk [vmem:[#allocation18 + $0x68] sm:$0xff] %vm461_vm2, %v1748_v20  ;;  %4845 = vmatmul.mubr.msk.f32.vlgmr.msra.gmra.mrb[28].mxu1 %vm461_vm2, %v1748_v20 }
 0x698   :  { %5094 = vmatpush3.bf16.msra.mxu1 %v5091_v14  ;;  %4871 = vmatprep.mubr.msk.f32.mxu1 %vm171_vm0, %v5728_v11 }
 0x699   :  { %5096 = vmatprep.subr.bf16.mxu1 %v5095_v23 }
 0x69c   :  { %5098 = vmatpush3.bf16.msra.mxu1 %v5095_v23 }
 0x69d   :  { %5100 = vmatprep.subr.bf16.mxu1 %v5099_v27 }
 0x69f   :  { %4872 = vmatmul.mubr.msk.f32.vlgmr.msra.gmra.mrb[30].mxu1 %vm171_vm0, %v5734_v18 }
 0x6a0   :  { %5102 = vmatpush3.bf16.msra.mxu1 %v5099_v27  ;;  %4874 = vmatprep.mubr.msk.f32.mxu1 %vm171_vm0, %v5736_v19 }
 0x6a1   :  { %5104 = vmatprep.subr.bf16.mxu1 %v5103_v29 }
 0x6a3   :  { %4875 = vmatmul.mubr.msk.f32.gmra.mrb[32].mxu1 %vm171_vm0, %v5744_v21 }
 0x6a4   :  { %5106 = vmatpush3.bf16.msra.mxu1 %v5103_v29  ;;  %4885 = vmatprep.mubr.msk.f32.mxu1 %vm171_vm0, %v5728_v11 }
 0x6a5   :  { %4905 = vmatprep.subr.mxu1 %v5509_v22 }
 0x6a7   :  { %4886 = vmatmul.mubr.msk.f32.vlgmr.msra.gmra.mrb[34].mxu1 %vm171_vm0, %v5734_v18 }
 0x6a8   :  { %4888 = vmatprep.mubr.msk.f32.mxu1 %vm171_vm0, %v5736_v19 }
 0x6ab   :  { %4889 = vmatmul.mubr.msk.f32.gmra.mrb[36].mxu1 %vm171_vm0, %v5744_v21 }
 0x6ac   :  { %4907 = vmatprep.mubr.msk.f32.mxu1 %vm5510_vm1, %v5509_v22 }
 0x761   :  { %v1823_v32 = vpop.f32.mrb[22].mxu0 }
 0x762   :  { %v4831_v33 = vpop.f32.mrb[23].mxu0  ;;  %4849 = vmatprep.mubr.msk.f32.mxu0 %vm461_vm2, %v1823_v32 }
 0x765   :  { %v1969_v36 = vpop.f32.mrb[24].mxu0 }
 0x766   :  { %v1896_v38 = vpop.f32.mrb[26].mxu1  ;;  %v4841_v39 = vpop.f32.mrb[25].mxu0 }
 0x767   :  { %v4836_v40 = vpop.f32.mrb[27].mxu1  ;;  %4850 = vmatmul.mubr.msk.f32.vlgmr.msra.gmra.mrb[26].mxu0 %vm461_vm2, %v1896_v38 }
 0x768   :  { %4852 = vmatprep.mubr.msk.f32.mxu0 %vm461_vm2, %v1969_v36  ;;  %4856 = vmatpush3.msra.mxu0 %v1106_v31 }
 0x769   :  { %5108 = vmatprep.subr.bf16.mxu0 %v5107_v37 }
 0x76a   :  { %v2042_v42 = vpop.f32.mrb[28].mxu1 }
 0x76b   :  { %v4846_v46 = vpop.f32.mrb[29].mxu1  ;;  %4853 = vmatmul.mubr.msk.f32.gmra.mrb[28].mxu0 %vm461_vm2, %v2042_v42 }
 0x76c   :  { %4857 = vmatprep.mubr.msk.f32.mxu0 %vm461_vm2, %v5852_v55 }
 0x76f   :  { %4858 = vmatmul.mubr.msk.f32.vlgmr.msra.gmra.mrb[26].mxu0 %vm461_vm2, %v5850_v53  ;;  %v4445_v53 = vld [vmem:[#allocation10 + $0x2] ss:$0 sm:$0xff] }
 0x770   :  { %5110 = vmatpush3.bf16.msra.mxu0 %v5107_v37  ;;  %4860 = vmatprep.mubr.msk.f32.mxu0 %vm461_vm2, %v5856_v59 }
 0x771   :  { %5112 = vmatprep.subr.bf16.mxu0 %v5111_v47 }
 0x772   :  { %v4873_v41 = vpop.f32.mrb[30].mxu1 }
 0x773   :  { %v2321_v43 = vpop.f32.mrb[31].mxu1  ;;  %4861 = vmatmul.mubr.msk.f32.gmra.mrb[28].mxu0 %vm461_vm2, %v5854_v56 }
 0x774   :  { %5114 = vmatpush3.bf16.msra.mxu0 %v5111_v47  ;;  %4899 = vmatprep.mubr.msk.f32.mxu0 %vm171_vm0, %v5728_v11  ;;  %v2327_v11 = vadd.f32 %v4873_v41, %v4440_v49 }
 0x775   :  { %4910 = vmatprep.subr.mxu0 %v5509_v22 }
 0x776   :  { %v4876_v55 = vpop.f32.mrb[32].mxu1 }
 0x777   :  { %v2331_v48 = vpop.f32.mrb[33].mxu1  ;;  %4900 = vmatmul.mubr.msk.f32.vlgmr.msra.gmra.mrb[30].mxu0 %vm171_vm0, %v5734_v18  ;;  %v2322_v18 = vadd.f32 %v4440_v49, %v2321_v43 }
 0x778   :  { %4902 = vmatprep.mubr.msk.f32.mxu0 %vm171_vm0, %v5736_v19  ;;  %v2332_v58 = vadd.f32 %v4440_v49, %v2331_v48 }
 0x77a   :  { %v4887_v59 = vpop.f32.mrb[34].mxu1 }
 0x77b   :  { %v2425_v50 = vadd.f32 %v4887_v59, %v4445_v53  ;;  %v2419_v51 = vpop.f32.mrb[35].mxu1  ;;  %4903 = vmatmul.mubr.msk.f32.gmra.mrb[32].mxu0 %vm171_vm0, %v5744_v21  ;;  %v2337_v21 = vadd.f32 %v4876_v55, %v4440_v49 }
 0x77c   :  { %v2420_v56 = vadd.f32 %v4445_v53, %v2419_v51  ;;  %4912 = vmatprep.mubr.msk.f32.mxu0 %vm5510_vm1, %v5509_v22  ;;  %v5236_v51 = vld [vmem:[#allocation2] sm:$0xff] }
 0x77d   :  { %4911 = vmatpush3.xpose.msk.msra.mxu0 %vm461_vm2, %v2425_v50 }
 0x77e   :  { %v4890_v52 = vpop.f32.mrb[36].mxu1  ;;  %4906 = vmatpush3.xpose.msk.msra.mxu1 %vm461_vm2, %v2420_v56  ;;  %4920 = vmatprep.subr.mxu0 %v5509_v22  ;;  %v3182_v56 = vld [vmem:[#allocation14 + $0x10] sm:$0xff] }
 0x77f   :  { %v2435_v19 = vadd.f32 %v4890_v52, %v4445_v53  ;;  %v2429_v54 = vpop.f32.mrb[37].mxu1  ;;  %4915 = vmatprep.subr.mxu1 %v5509_v22  ;;  %v3384_v52 = vld [vmem:[#allocation8 + $0x68] sm:$0xff] }
 0x780   :  { %v2430_v57 = vadd.f32 %v4445_v53, %v2429_v54  ;;  %4913 = vmatmul.mubr.msk.f32.vlgmr.msra.gmra.mrb[34].mxu0 %vm461_vm2, %v2327_v11  ;;  %v3383_v11 = vld [vmem:[#allocation8 + $0x60] sm:$0xff] }
 0x781   :  { %4908 = vmatmul.mubr.msk.f32.vlgmr.msra.gmra.mrb[38].mxu1 %vm461_vm2, %v2322_v18  ;;  %4921 = vmatpush3.xpose.msk.msra.mxu0 %vm461_vm2, %v2435_v19  ;;  %v5123_v18 = vpack.c.bf16 %v3384_v52, %v3383_v11  ;;  %v3285_v19 = vld [vmem:[#allocation5 + $0x60] sm:$0xff]  ;;  %v3286_v54 = vld [vmem:[#allocation5 + $0x68] sm:$0xff] }
 0x782   :  { %4916 = vmatpush3.xpose.msk.msra.mxu1 %vm461_vm2, %v2430_v57  ;;  %4922 = vmatprep.mubr.msk.f32.mxu0 %vm5510_vm1, %v5509_v22  ;;  %v5115_v57 = vpack.c.bf16 %v3286_v54, %v3285_v19 }
 0x783   :  { %4917 = vmatprep.mubr.msk.f32.mxu1 %vm5510_vm1, %v5509_v22  ;;  %4925 = vmatprep.subr.mxu1 %v5509_v22 }
 0x784   :  { %4923 = vmatmul.mubr.msk.f32.vlgmr.msra.gmra.mrb[36].mxu0 %vm461_vm2, %v2337_v21  ;;  %4930 = vmatprep.subr.mxu0 %v5509_v22  ;;  %v3287_v21 = vld [vmem:[#allocation5 + $0x70] sm:$0xff] }
 0x785   :  { %4918 = vmatmul.mubr.msk.f32.vlgmr.msra.gmra.mrb[40].mxu1 %vm461_vm2, %v2332_v58  ;;  %4932 = vmatprep.mubr.msk.f32.mxu0 %vm5510_vm1, %v5509_v22  ;;  %v3288_v58 = vld [vmem:[#allocation5 + $0x78] sm:$0xff] }
 0x786   :  { %4927 = vmatprep.mubr.msk.f32.mxu1 %vm5510_vm1, %v5509_v22 }
 0x84a   :  { %v4901_v61 = vpop.f32.mrb[30].mxu0 }
 0x84b   :  { %v2523_v62 = vadd.f32 %v4901_v61, %v4450_v60  ;;  %v2517_v63 = vpop.f32.mrb[31].mxu0  ;;  %v5237_v61 = vld [vmem:[#allocation2 + $0x8] sm:$0xff] }
 0x84c   :  { %v2518_v0 = vadd.f32 %v4450_v60, %v2517_v63  ;;  %v3481_v63 = vld [vmem:[#allocation11 + $0x60] sm:$0xff] }
 0x84d   :  { %4931 = vmatpush3.msra.mxu0 %v2523_v62  ;;  %v5238_v62 = vld [vmem:[#allocation2 + $0x10] sm:$0xff] }
 0x84e   :  { %v4904_v1 = vpop.f32.mrb[32].mxu0  ;;  %4926 = vmatpush3.msra.mxu1 %v2518_v0  ;;  %4940 = vmatprep.subr.mxu0 %v5509_v22  ;;  %v3482_v0 = vld [vmem:[#allocation11 + $0x68] sm:$0xff] }
 0x84f   :  { %v5966_v2 = vadd.f32 %v4904_v1, %v4450_v60  ;;  %v2527_v3 = vpop.f32.mrb[33].mxu0  ;;  %4935 = vmatprep.subr.mxu1 %v5509_v22  ;;  %v3483_v1 = vld [vmem:[#allocation11 + $0x70] sm:$0xff] }
 0x850   :  { %v5969_v4 = vadd.f32 %v4450_v60, %v2527_v3  ;;  %v5119_v60 = vpack.c.bf16 %v3288_v58, %v3287_v21  ;;  %v3484_v3 = vld [vmem:[#allocation11 + $0x78] sm:$0xff] }
 0x853   :  { %v2684_v5 = vpop.f32.mrb[34].mxu0 }
 0x854   :  { %v2608_v6 = vpop.f32.mrb[38].mxu1  ;;  %v4914_v7 = vpop.f32.mrb[35].mxu0  ;;  %v2843_v8 = vsel %vm461_vm2, %v2684_v5, -inf }
 0x855   :  { %2844 = vmax.xlane.f32.xlu1 %v2843_v8  ;;  %v4909_v9 = vpop.f32.mrb[39].mxu1  ;;  %v2840_v10 = vsel %vm461_vm2, %v2608_v6, -inf  ;;  %v3386_v7 = vld [vmem:[#allocation8 + $0x78] sm:$0xff] }
 0x856   :  { %2841 = vmax.xlane.f32.xlu0 %v2840_v10 }
 0x857   :  { %v2836_v12 = vpop.f32.mrb[36].mxu0 }
 0x858   :  { %v2760_v13 = vpop.f32.mrb[40].mxu1  ;;  %v4924_v14 = vpop.f32.mrb[37].mxu0  ;;  %v2849_v15 = vsel %vm461_vm2, %v2836_v12, -inf }
 0x859   :  { %2850 = vmax.xlane.f32.xlu1 %v2849_v15  ;;  %v4919_v16 = vpop.f32.mrb[41].mxu1  ;;  %v2846_v17 = vsel %vm461_vm2, %v2760_v13, -inf }
 0x85a   :  { %2847 = vmax.xlane.f32.xlu0 %v2846_v17 }
 0x8e2   :  { %v2845_v20 = vpop.xlane.xlu1 %2844 }
 0x8e3   :  { %v2853_v23 = vsub.f32 %v2684_v5, %v2845_v20  ;;  %v2842_v24 = vpop.xlane.xlu0 %2841  ;;  %v5239_v5 = vld [vmem:[#allocation2 + $0x18] sm:$0xff] }
 0x8e4   :  { %v2852_v25 = vsub.f32 %v2608_v6, %v2842_v24  ;;  %v3385_v6 = vld [vmem:[#allocation8 + $0x70] sm:$0xff] }
 0x8e5   :  { %v2858_v27 = vmul.f32 1.442695, %v2853_v23 }
 0x8e6   :  { %v2856_v28 = vmul.f32 1.442695, %v2852_v25  ;;  %v2851_v26 = vpop.xlane.xlu1 %2850 }
 0x8e7   :  { %5204 = vpow2.f32 %v2858_v27  ;;  %v2855_v29 = vsub.f32 %v2836_v12, %v2851_v26  ;;  %v2848_v30 = vpop.xlane.xlu0 %2847  ;;  %v5127_v12 = vpack.c.bf16 %v3386_v7, %v3385_v6  ;;  %v4481_v26 = vld [vmem:[#allocation13 + $0x3] ss:$0 sm:$0xff] }
 0x8e8   :  { %5206 = vpow2.f32 %v2856_v28  ;;  %v2854_v31 = vsub.f32 %v2760_v13, %v2848_v30 }
 0x8e9   :  { %v2862_v32 = vmul.f32 1.442695, %v2855_v29 }
 0x8ea   :  { %v2860_v33 = vmul.f32 1.442695, %v2854_v31 }
 0x8eb   :  { %5208 = vpow2.f32 %v2862_v32 }
 0x8ec   :  { %5210 = vpow2.f32 %v2860_v33  ;;  %v4476_v33 = vld [vmem:[#allocation10 + $0x3] ss:$0 sm:$0xff] }
 0x8f1   :  { %v5205_v34 = vpop.eup %5204 }
 0x8f2   :  { %v5207_v35 = vpop.eup %5206  ;;  %v2867_v36 = vsel %vm461_vm2, %v5205_v34, 0.0 }
 0x8f3   :  { %2868 = vadd.xlane.f32.xlu1 %v2867_v36  ;;  %v2864_v37 = vsel %vm461_vm2, %v5207_v35, 0.0 }
 0x8f4   :  { %2865 = vadd.xlane.f32.xlu0 %v2864_v37 }
 0x8f5   :  { %v5209_v38 = vpop.eup %5208 }
 0x8f6   :  { %v5211_v39 = vpop.eup %5210  ;;  %v2873_v40 = vsel %vm461_vm2, %v5209_v38, 0.0 }
 0x8f7   :  { %2874 = vadd.xlane.f32.xlu1 %v2873_v40  ;;  %v2870_v42 = vsel %vm461_vm2, %v5211_v39, 0.0 }
 0x8f8   :  { %2871 = vadd.xlane.f32.xlu0 %v2870_v42 }
 0x980   :  { %v2869_v44 = vpop.xlane.xlu1 %2868 }
 0x981   :  { %5212 = vrcp.f32 %v2869_v44  ;;  %v2866_v45 = vpop.xlane.xlu0 %2865 }
 0x982   :  { %5214 = vrcp.f32 %v2866_v45 }
 0x984   :  { %v2875_v46 = vpop.xlane.xlu1 %2874 }
 0x985   :  { %5216 = vrcp.f32 %v2875_v46  ;;  %v2872_v47 = vpop.xlane.xlu0 %2871 }
 0x986   :  { %5218 = vrcp.f32 %v2872_v47 }
 0x98b   :  { %v5213_v41 = vpop.eup %5212 }
 0x98c   :  { %v5215_v43 = vpop.eup %5214  ;;  %v2881_v55 = vmul.f32 %v5213_v41, %v5205_v34  ;;  %v4471_v34 = vld [vmem:[#allocation7 + $0x3] ss:$0 sm:$0xff] }
 0x98d   :  { %v2880_v48 = vmul.f32 %v5215_v43, %v5207_v35 }
 0x98e   :  { %2886 = vst.msk [vmem:[#allocation18 + $0x30] sm:$0xff] %vm461_vm2, %v2881_v55  ;;  %4933 = vmatmul.mubr.msk.f32.vlgmr.msra.gmra.mrb[38].mxu0 %vm461_vm2, %v2881_v55 }
 0x98f   :  { %v5217_v53 = vpop.eup %5216  ;;  %2885 = vst.msk [vmem:[#allocation18 + $0x10] sm:$0xff] %vm461_vm2, %v2880_v48  ;;  %4941 = vmatpush3.msra.mxu0 %v5966_v2  ;;  %4928 = vmatmul.mubr.msk.f32.vlgmr.msra.gmra.mrb[42].mxu1 %vm461_vm2, %v2880_v48  ;;  %v5131_v2 = vpack.c.bf16 %v3482_v0, %v3481_v63 }
 0x990   :  { %v5219_v59 = vpop.eup %5218  ;;  %v2883_v49 = vmul.f32 %v5217_v53, %v5209_v38  ;;  %4936 = vmatpush3.msra.mxu1 %v5969_v4  ;;  %4942 = vmatprep.mubr.msk.f32.mxu0 %vm5510_vm1, %v5509_v22  ;;  %v5135_v4 = vpack.c.bf16 %v3484_v3, %v3483_v1 }
 0x991   :  { %v2882_v50 = vmul.f32 %v5219_v59, %v5211_v39  ;;  %4937 = vmatprep.mubr.msk.f32.mxu1 %vm5510_vm1, %v5509_v22  ;;  %4945 = vmatprep.subr.mxu0 %v3182_v56 }
 0x992   :  { %2888 = vst.msk [vmem:[#allocation18 + $0x70] sm:$0xff] %vm461_vm2, %v2883_v49  ;;  %4943 = vmatmul.mubr.msk.f32.vlgmr.msra.gmra.mrb[40].mxu0 %vm461_vm2, %v2883_v49  ;;  %5116 = vmatprep.subr.bf16.mxu1 %v5115_v57 }
 0x993   :  { %2887 = vst.msk [vmem:[#allocation18 + $0x50] sm:$0xff] %vm461_vm2, %v2882_v50  ;;  %4938 = vmatmul.mubr.msk.f32.vlgmr.msra.gmra.mrb[44].mxu1 %vm461_vm2, %v2882_v50  ;;  %4946 = vmatpush3.msra.mxu0 %v3182_v56 }
 0x994   :  { %4961 = vmatprep.mubr.msk.f32.mxu1 %vm171_vm0, %v5236_v51  ;;  %5124 = vmatprep.subr.bf16.mxu0 %v5123_v18 }
 0x995   :  { %5118 = vmatpush3.bf16.msra.mxu1 %v5115_v57 }
 0x996   :  { %5120 = vmatprep.subr.bf16.mxu1 %v5119_v60 }
 0x999   :  { %5122 = vmatpush3.bf16.msra.mxu1 %v5119_v60 }
 0x99a   :  { %5132 = vmatprep.subr.bf16.mxu1 %v5131_v2 }
 0x99c   :  { %4962 = vmatmul.mubr.msk.f32.vlgmr.msra.gmra.mrb[46].mxu1 %vm171_vm0, %v5237_v61 }
 0x99d   :  { %4964 = vmatprep.mubr.msk.f32.mxu1 %vm171_vm0, %v5238_v62  ;;  %5134 = vmatpush3.bf16.msra.mxu1 %v5131_v2 }
 0x99e   :  { %5136 = vmatprep.subr.bf16.mxu1 %v5135_v4 }
 0x9a0   :  { %4965 = vmatmul.mubr.msk.f32.gmra.mrb[48].mxu1 %vm171_vm0, %v5239_v5 }
 0x9a1   :  { %4989 = vmatprep.mubr.msk.f32.mxu1 %vm171_vm0, %v5236_v51  ;;  %5138 = vmatpush3.bf16.msra.mxu1 %v5135_v4 }
 0x9a2   :  { %5000 = vmatprep.subr.mxu1 %v5509_v22 }
 0x9a4   :  { %4990 = vmatmul.mubr.msk.f32.vlgmr.msra.gmra.mrb[50].mxu1 %vm171_vm0, %v5237_v61 }
 0x9a5   :  { %4992 = vmatprep.mubr.msk.f32.mxu1 %vm171_vm0, %v5238_v62 }
 0x9a8   :  { %4993 = vmatmul.mubr.msk.f32.gmra.mrb[52].mxu1 %vm171_vm0, %v5239_v5 }
 0x9a9   :  { %5002 = vmatprep.mubr.msk.f32.mxu1 %vm5510_vm1, %v5509_v22 }
 0xa61   :  { %v3031_v8 = vpop.f32.mrb[38].mxu0 }
 0xa62   :  { %v2958_v9 = vpop.f32.mrb[42].mxu1  ;;  %v4934_v10 = vpop.f32.mrb[39].mxu0 }
 0xa63   :  { %v4929_v13 = vpop.f32.mrb[43].mxu1  ;;  %4947 = vmatprep.mubr.msk.f32.mxu0 %vm461_vm2, %v2958_v9 }
 0xa64   :  { %4948 = vmatmul.mubr.msk.f32.vlgmr.msra.gmra.mrb[26].mxu0 %vm461_vm2, %v3031_v8 }
 0xa65   :  { %v3177_v14 = vpop.f32.mrb[40].mxu0  ;;  %5126 = vmatpush3.bf16.msra.mxu0 %v5123_v18 }
 0xa66   :  { %v3104_v15 = vpop.f32.mrb[44].mxu1  ;;  %v4944_v16 = vpop.f32.mrb[41].mxu0  ;;  %5128 = vmatprep.subr.bf16.mxu0 %v5127_v12 }
 0xa67   :  { %v4939_v17 = vpop.f32.mrb[45].mxu1  ;;  %4950 = vmatprep.mubr.msk.f32.mxu0 %vm461_vm2, %v3104_v15 }
 0xa68   :  { %4951 = vmatmul.mubr.msk.f32.gmra.mrb[28].mxu0 %vm461_vm2, %v3177_v14 }
 0xa69   :  { %5130 = vmatpush3.bf16.msra.mxu0 %v5127_v12  ;;  %4975 = vmatprep.mubr.msk.f32.mxu0 %vm171_vm0, %v5236_v51 }
 0xa6a   :  { %4995 = vmatprep.subr.mxu0 %v5509_v22 }
 0xa6c   :  { %4976 = vmatmul.mubr.msk.f32.vlgmr.msra.gmra.mrb[42].mxu0 %vm171_vm0, %v5237_v61 }
 0xa6d   :  { %4978 = vmatprep.mubr.msk.f32.mxu0 %vm171_vm0, %v5238_v62 }
 0xa6f   :  { %v4963_v20 = vpop.f32.mrb[46].mxu1 }
 0xa70   :  { %4979 = vmatmul.mubr.msk.f32.gmra.mrb[44].mxu0 %vm171_vm0, %v5239_v5  ;;  %v3363_v23 = vpop.f32.mrb[47].mxu1  ;;  %v3369_v39 = vadd.f32 %v4963_v20, %v4471_v34 }
 0xa71   :  { %4997 = vmatprep.mubr.msk.f32.mxu0 %vm5510_vm1, %v5509_v22  ;;  %v3364_v40 = vadd.f32 %v4471_v34, %v3363_v23 }
 0xa73   :  { %v4966_v24 = vpop.f32.mrb[48].mxu1 }
 0xa74   :  { %v3373_v25 = vpop.f32.mrb[49].mxu1  ;;  %v3379_v47 = vadd.f32 %v4966_v24, %v4471_v34 }
 0xa75   :  { %v3374_v41 = vadd.f32 %v4471_v34, %v3373_v25 }
 0xa77   :  { %v4991_v27 = vpop.f32.mrb[50].mxu1 }
 0xa78   :  { %v3559_v28 = vpop.f32.mrb[51].mxu1  ;;  %v3565_v43 = vadd.f32 %v4991_v27, %v4481_v26 }
 0xa79   :  { %v3560_v55 = vadd.f32 %v4481_v26, %v3559_v28 }
 0xa7b   :  { %v4994_v29 = vpop.f32.mrb[52].mxu1 }
 0xa7c   :  { %v6015_v30 = vadd.f32 %v4994_v29, %v4481_v26  ;;  %v3569_v31 = vpop.f32.mrb[53].mxu1 }
 0xa7d   :  { %v6017_v32 = vadd.f32 %v4481_v26, %v3569_v31 }
 0xb3f   :  { %v4977_v35 = vpop.f32.mrb[42].mxu0 }
 0xb40   :  { %v3467_v36 = vadd.f32 %v4977_v35, %v4476_v33  ;;  %v3461_v37 = vpop.f32.mrb[43].mxu0 }
 0xb41   :  { %v3462_v38 = vadd.f32 %v4476_v33, %v3461_v37 }
 0xb42   :  { %5001 = vmatpush3.xpose.msk.msra.mxu1 %vm461_vm2, %v3467_v36 }
 0xb43   :  { %v4980_v42 = vpop.f32.mrb[44].mxu0  ;;  %4996 = vmatpush3.xpose.msk.msra.mxu0 %vm461_vm2, %v3462_v38  ;;  %5010 = vmatprep.subr.mxu1 %v5509_v22 }
 0xb44   :  { %v3477_v44 = vadd.f32 %v4980_v42, %v4476_v33  ;;  %v3471_v45 = vpop.f32.mrb[45].mxu0  ;;  %5005 = vmatprep.subr.mxu0 %v5509_v22 }
 0xb45   :  { %v3472_v46 = vadd.f32 %v4476_v33, %v3471_v45  ;;  %5003 = vmatmul.mubr.msk.f32.vlgmr.msra.gmra.mrb[54].mxu1 %vm461_vm2, %v3369_v39 }
 0xb46   :  { %4998 = vmatmul.mubr.msk.f32.vlgmr.msra.gmra.mrb[46].mxu0 %vm461_vm2, %v3364_v40  ;;  %5011 = vmatpush3.xpose.msk.msra.mxu1 %vm461_vm2, %v3477_v44 }
 0xb47   :  { %5006 = vmatpush3.xpose.msk.msra.mxu0 %vm461_vm2, %v3472_v46  ;;  %5012 = vmatprep.mubr.msk.f32.mxu1 %vm5510_vm1, %v5509_v22 }
 0xb48   :  { %5007 = vmatprep.mubr.msk.f32.mxu0 %vm5510_vm1, %v5509_v22  ;;  %5015 = vmatprep.subr.mxu0 %v5509_v22 }
 0xb49   :  { %5013 = vmatmul.mubr.msk.f32.vlgmr.msra.gmra.mrb[56].mxu1 %vm461_vm2, %v3379_v47  ;;  %5020 = vmatprep.subr.mxu1 %v5509_v22 }
 0xb4a   :  { %5008 = vmatmul.mubr.msk.f32.vlgmr.msra.gmra.mrb[48].mxu0 %vm461_vm2, %v3374_v41  ;;  %5021 = vmatpush3.msra.mxu1 %v3565_v43 }
 0xb4b   :  { %5016 = vmatpush3.msra.mxu0 %v3560_v55  ;;  %5022 = vmatprep.mubr.msk.f32.mxu1 %vm5510_vm1, %v5509_v22 }
 0xb4c   :  { %5030 = vmatprep.subr.mxu1 %v5509_v22  ;;  %5017 = vmatprep.mubr.msk.f32.mxu0 %vm5510_vm1, %v5509_v22 }
 0xb4d   :  { %5025 = vmatprep.subr.mxu0 %v5509_v22 }
 0xc18   :  { %v3726_v48 = vpop.f32.mrb[54].mxu1 }
 0xc19   :  { %v3650_v53 = vpop.f32.mrb[46].mxu0  ;;  %v3885_v59 = vsel %vm461_vm2, %v3726_v48, -inf  ;;  %v5004_v49 = vpop.f32.mrb[55].mxu1 }
 0xc1a   :  { %3886 = vmax.xlane.f32.xlu1 %v3885_v59  ;;  %v3882_v50 = vsel %vm461_vm2, %v3650_v53, -inf  ;;  %v4999_v51 = vpop.f32.mrb[47].mxu0 }
 0xc1b   :  { %3883 = vmax.xlane.f32.xlu0 %v3882_v50 }
 0xc1c   :  { %v3878_v56 = vpop.f32.mrb[56].mxu1 }
 0xc1d   :  { %v3802_v11 = vpop.f32.mrb[48].mxu0  ;;  %v3891_v52 = vsel %vm461_vm2, %v3878_v56, -inf  ;;  %v5014_v18 = vpop.f32.mrb[57].mxu1 }
 0xc1e   :  { %3892 = vmax.xlane.f32.xlu1 %v3891_v52  ;;  %v3888_v19 = vsel %vm461_vm2, %v3802_v11, -inf  ;;  %v5009_v54 = vpop.f32.mrb[49].mxu0 }
 0xc1f   :  { %3889 = vmax.xlane.f32.xlu0 %v3888_v19 }
 0xca7   :  { %v3887_v57 = vpop.xlane.xlu1 %3886 }
 0xca8   :  { %v3895_v21 = vsub.f32 %v3726_v48, %v3887_v57  ;;  %v3884_v58 = vpop.xlane.xlu0 %3883 }
 0xca9   :  { %v3894_v60 = vsub.f32 %v3650_v53, %v3884_v58 }
 0xcaa   :  { %v3900_v61 = vmul.f32 1.442695, %v3895_v21 }
 0xcab   :  { %v3898_v62 = vmul.f32 1.442695, %v3894_v60  ;;  %v3893_v63 = vpop.xlane.xlu1 %3892 }
 0xcac   :  { %5220 = vpow2.f32 %v3900_v61  ;;  %v3897_v0 = vsub.f32 %v3878_v56, %v3893_v63  ;;  %v3890_v1 = vpop.xlane.xlu0 %3889 }
 0xcad   :  { %5222 = vpow2.f32 %v3898_v62  ;;  %v3896_v2 = vsub.f32 %v3802_v11, %v3890_v1 }
 0xcae   :  { %v3904_v3 = vmul.f32 1.442695, %v3897_v0 }
 0xcaf   :  { %v3902_v4 = vmul.f32 1.442695, %v3896_v2 }
 0xcb0   :  { %5224 = vpow2.f32 %v3904_v3 }
 0xcb1   :  { %5226 = vpow2.f32 %v3902_v4 }
 0xcb6   :  { %v5221_v5 = vpop.eup %5220 }
 0xcb7   :  { %v5223_v6 = vpop.eup %5222  ;;  %v3909_v7 = vsel %vm461_vm2, %v5221_v5, 0.0 }
 0xcb8   :  { %3910 = vadd.xlane.f32.xlu1 %v3909_v7  ;;  %v3906_v8 = vsel %vm461_vm2, %v5223_v6, 0.0 }
 0xcb9   :  { %3907 = vadd.xlane.f32.xlu0 %v3906_v8 }
 0xcba   :  { %v5225_v9 = vpop.eup %5224 }
 0xcbb   :  { %v5227_v10 = vpop.eup %5226  ;;  %v3915_v12 = vsel %vm461_vm2, %v5225_v9, 0.0 }
 0xcbc   :  { %3916 = vadd.xlane.f32.xlu1 %v3915_v12  ;;  %v3912_v13 = vsel %vm461_vm2, %v5227_v10, 0.0 }
 0xcbd   :  { %3913 = vadd.xlane.f32.xlu0 %v3912_v13 }
 0xd45   :  { %v3911_v14 = vpop.xlane.xlu1 %3910 }
 0xd46   :  { %5228 = vrcp.f32 %v3911_v14  ;;  %v3908_v15 = vpop.xlane.xlu0 %3907 }
 0xd47   :  { %5230 = vrcp.f32 %v3908_v15 }
 0xd49   :  { %v3917_v16 = vpop.xlane.xlu1 %3916 }
 0xd4a   :  { %5232 = vrcp.f32 %v3917_v16  ;;  %v3914_v17 = vpop.xlane.xlu0 %3913 }
 0xd4b   :  { %5234 = vrcp.f32 %v3914_v17 }
 0xd50   :  { %v5229_v20 = vpop.eup %5228 }
 0xd51   :  { %v5231_v23 = vpop.eup %5230  ;;  %v3923_v24 = vmul.f32 %v5229_v20, %v5221_v5 }
 0xd52   :  { %v3922_v25 = vmul.f32 %v5231_v23, %v5223_v6 }
 0xd53   :  { %3928 = vst.msk [vmem:[#allocation18 + $0x38] sm:$0xff] %vm461_vm2, %v3923_v24  ;;  %5023 = vmatmul.mubr.msk.f32.vlgmr.msra.gmra.mrb[58].mxu1 %vm461_vm2, %v3923_v24 }
 0xd54   :  { %v5233_v27 = vpop.eup %5232  ;;  %3927 = vst.msk [vmem:[#allocation18 + $0x18] sm:$0xff] %vm461_vm2, %v3922_v25  ;;  %5031 = vmatpush3.msra.mxu1 %v6015_v30  ;;  %5018 = vmatmul.mubr.msk.f32.vlgmr.msra.gmra.mrb[50].mxu0 %vm461_vm2, %v3922_v25  ;;  %v4224_v30 = vld [vmem:[#allocation14 + $0x18] sm:$0xff] }
 0xd55   :  { %v5235_v28 = vpop.eup %5234  ;;  %v3925_v26 = vmul.f32 %v5233_v27, %v5225_v9  ;;  %5026 = vmatpush3.msra.mxu0 %v6017_v32  ;;  %5032 = vmatprep.mubr.msk.f32.mxu1 %vm5510_vm1, %v5509_v22 }
 0xd56   :  { %v3924_v29 = vmul.f32 %v5235_v28, %v5227_v10  ;;  %5027 = vmatprep.mubr.msk.f32.mxu0 %vm5510_vm1, %v5509_v22  ;;  %5035 = vmatprep.subr.mxu0 %v4224_v30 }
 0xd57   :  { %3930 = vst.msk [vmem:[#allocation18 + $0x78] sm:$0xff] %vm461_vm2, %v3925_v26  ;;  %5033 = vmatmul.mubr.msk.f32.vlgmr.msra.gmra.mrb[60].mxu1 %vm461_vm2, %v3925_v26 }
 0xd58   :  { %3929 = vst.msk [vmem:[#allocation18 + $0x58] sm:$0xff] %vm461_vm2, %v3924_v29  ;;  %5028 = vmatmul.mubr.msk.f32.vlgmr.msra.gmra.mrb[52].mxu0 %vm461_vm2, %v3924_v29 }
 0xd59   :  { %5036 = vmatpush3.msra.mxu0 %v4224_v30 }
 0xe26   :  { %v4073_v31 = vpop.f32.mrb[58].mxu1 }
 0xe27   :  { %v4000_v32 = vpop.f32.mrb[50].mxu0  ;;  %v5024_v33 = vpop.f32.mrb[59].mxu1 }
 0xe28   :  { %v5019_v34 = vpop.f32.mrb[51].mxu0  ;;  %5037 = vmatprep.mubr.msk.f32.mxu0 %vm461_vm2, %v4000_v32 }
 0xe29   :  { %5038 = vmatmul.mubr.msk.f32.vlgmr.msra.gmra.mrb[26].mxu0 %vm461_vm2, %v4073_v31 }
 0xe2a   :  { %v4219_v22 = vpop.f32.mrb[60].mxu1 }
 0xe2b   :  { %v4146_v35 = vpop.f32.mrb[52].mxu0  ;;  %v5034_v36 = vpop.f32.mrb[61].mxu1 }
 0xe2c   :  { %v5029_v37 = vpop.f32.mrb[53].mxu0  ;;  %5040 = vmatprep.mubr.msk.f32.mxu0 %vm461_vm2, %v4146_v35 }
 0xe2d   :  { %5041 = vmatmul.mubr.msk.f32.gmra.mrb[28].mxu0 %vm461_vm2, %v4219_v22 }
 0xe2e   :  { %5449 = shalt.err (!%p5446_p6)
}
 0xe2f   :  { %s5450_s14 = scalar_lea.hbm %s6111_s10, 2048 }
 0xe30   :  { %p5451_p7 = scmp.ne.s32.totalorder %s6111_s10, %s5450_s14  ;;  %p5454_p8 = scmp.lt.u32.totalorder %s5450_s14, %s6111_s10 }
 0xe32   :  { %p5456_p9 = pnand %p5454_p8, %p5451_p7 }
 0xe34   :  { %5459 = shalt.err (!%p5456_p9)
}
 0xe35   :  { %4364 = dma.vmem_to_hbm [thread:$0]  %s4359_s3, 2048, %s6111_s10, [#allocation19], %s5498_s25, %s5498_s25, %s5499_s26   ;;  %v4502_v38 = vld [vmem:[#allocation16] ss:$0 sm:$0xff] }
 0xe36   :  { %s5512_s4 = smov [#allocation17]  }
 0xe37   :  { %s4346_s29 = sshll.u32 %s5512_s4, 4  ;;  %s4347_s29 = int_to_ptr.vmem [resolvable:$true] %s4346_s29 }
 0xe38   :  { %s5460_s10 = scalar_lea.vmem %s4347_s29, 512  ;;  %p5465_p11 = scmp.lt.s32.totalorder %s4347_s29, %s4347_s29 }
 0xe39   :  { %p5461_p10 = scmp.ne.s32.totalorder %s4347_s29, %s5460_s10  ;;  %p5466_p12 = scmp.lt.s32.totalorder %s5460_s10, %s5460_s10 }
 0xe3b   :  { %p5467_p13 = por %p5466_p12, %p5465_p11 }
 0xe3d   :  { %p5468_p0 = pnand %p5467_p13, %p5461_p10 }
 0xefc   :  { %v5039_v39 = vpop.f32.mrb[26].mxu0 }
 0xefd   :  { %v4334_v40 = vadd.f32 %v5039_v39, %v4502_v38  ;;  %v4303_v42 = vpop.f32.mrb[27].mxu0 }
 0xefe   :  { %v4333_v44 = vadd.f32 %v4502_v38, %v4303_v42 }
 0xeff   :  { %4338 = vst.msk [vmem:[#allocation17 + $0x8] sm:$0xff] %vm171_vm0, %v4334_v40 }
 0xf00   :  { %4337 = vst.msk [vmem:[#allocation17] sm:$0xff] %vm171_vm0, %v4333_v44  ;;  %v5042_v45 = vpop.f32.mrb[28].mxu0 }
 0xf01   :  { %v4336_v46 = vadd.f32 %v5042_v45, %v4502_v38  ;;  %v4313_v47 = vpop.f32.mrb[29].mxu0 }
 0xf02   :  { %v4335_v41 = vadd.f32 %v4502_v38, %v4313_v47 }
 0xf03   :  { %4340 = vst.msk [vmem:[#allocation17 + $0x18] sm:$0xff] %vm171_vm0, %v4336_v46 }
 0xf04   :  { %4339 = vst.msk [vmem:[#allocation17 + $0x10] sm:$0xff] %vm171_vm0, %v4335_v41 }
 0xf05   :  { %5471 = shalt.err (!%p5468_p0)
}
 0xf06   :  { %s5472_s16 = scalar_lea.hbm %s6110_s9, 512 }
 0xf07   :  { %p5473_p1 = scmp.ne.s32.totalorder %s6110_s9, %s5472_s16  ;;  %p5476_p2 = scmp.lt.u32.totalorder %s5472_s16, %s6110_s9 }
 0xf09   :  { %p5478_p3 = pnand %p5476_p2, %p5473_p1 }
 0xf0b   :  { %5481 = shalt.err (!%p5478_p3)
}
 0xf0c   :  { %4352 = dma.vmem_to_hbm [thread:$0]  %s4347_s29, 512, %s6110_s9, [#allocation4], %s5498_s25, %s5498_s25, %s5499_s26  }
 0xf0d   :  { %5492 = dma.done.wait [#allocation4], 512  }
 0xf0e   :  { %5493 = vsyncadd [#allocation4], 4294966784 }
 0xf0f   :  { %5494 = dma.done.wait [#allocation19], 2048  }
 0xf10   :  { %5495 = vsyncadd [#allocation19], 4294965248 }
 0xf11   :  { %4371 = vsyncpa [#allocation3], 1 }
 0xf12   :  { %4372 = vsyncpa [#allocation6], 1 }
 0xf13   :  { %4373 = vsyncpa [#allocation9], 1 }
 0xf14   :  { %4374 = vsyncpa [#allocation12], 1 }
 0xf15   :  { %4375 = vsyncpa [#allocation15], 1 }
 0xf16   :  { %4376 = vsyncpa [#allocation4], 1 }
 0xf17   :  { %4377 = vsyncpa [#allocation19], 1 }

</bundles_post_ra>
